<compile_context>
chip_gen: v5e
topology: v5e:2x2
jax: 0.10.0
libtpu: 0.0.40
codegen_flags: <defaults>
</compile_context>

<pallas_src>
import jax
import jax.numpy as jnp
from jax.experimental import pallas as pl
from jax.experimental.pallas import tpu as pltpu  # noqa: F401  (TPU backend)


def scaled_conv1x1_kernel(w_ref, scale_ref, x_ref, o_ref):
    # w_ref:     (Cout, Cin)  conv 1x1 weight (possibly bf16, pre-cast once)
    # scale_ref: (1, Cin)     per-input-channel scale (from [1, Cin, 1, 1])
    # x_ref:     (Cin, M)     activations, channels-first, M = N*H*W
    # o_ref:     (Cout, M)
    #
    # Fold the scale into the weight: W @ (diag(s) X) == (W * s) @ X.
    # Fold in f32 (cheap: Cout x Cin elems; v5e VPU has no bf16 ALU anyway),
    # then cast to the activation dtype so the MXU sees matched operands
    # (bf16 x bf16 when the producer emits bf16, else f32 x f32).
    ws = w_ref[...].astype(jnp.float32) * scale_ref[...].astype(jnp.float32)
    ws = ws.astype(x_ref.dtype)
    acc = jnp.dot(ws, x_ref[...], preferred_element_type=jnp.float32)
    # TODO(synk): if a BatchNorm / SiLU follows this conv in the full network,
    # fold its scale/bias + activation here before the store (free: DMA-bound).
    o_ref[...] = acc.astype(o_ref.dtype)


def scaled_conv1x1(x157_scale, x152_act, weight, out_dtype=None):
    """Computes Conv2d_1x1(x157 * x152), PyTorch NCHW semantics, bias=False.

    Channels-first (Cin, H*W) layout: for N=1 every reshape below is a free
    view of the NCHW tensors, so no transposes on activations, weight, or
    output. `weight` may be (Cout, Cin, 1, 1) or (Cout, Cin), any dtype
    (pre-cast it to bf16 once — it is static — to halve its HBM traffic).
    """
    N, Cin, H, W = x152_act.shape
    assert N == 1, "channels-first free-reshape path assumes batch=1 (module spec)"
    M = N * H * W

    w2d = weight.reshape(weight.shape[0], Cin)      # (Cout, Cin), free reshape
    Cout = w2d.shape[0]
    x2d = x152_act.reshape(Cin, M)                  # free reshape for N=1
    scale2d = x157_scale.reshape(1, Cin)            # free reshape
    if out_dtype is None:
        out_dtype = x152_act.dtype

    bytes_accessed = (
        w2d.size * w2d.dtype.itemsize
        + scale2d.size * scale2d.dtype.itemsize
        + x2d.size * x2d.dtype.itemsize
        + Cout * M * jnp.dtype(out_dtype).itemsize
    )

    out2d = pl.pallas_call(
        scaled_conv1x1_kernel,
        out_shape=jax.ShapeDtypeStruct((Cout, M), out_dtype),
        in_specs=[
            pl.BlockSpec((Cout, Cin), lambda: (0, 0)),
            pl.BlockSpec((1, Cin), lambda: (0, 0)),
            pl.BlockSpec((Cin, M), lambda: (0, 0)),
        ],
        out_specs=pl.BlockSpec((Cout, M), lambda: (0, 0)),
        cost_estimate=pl.CostEstimate(
            flops=2 * Cout * Cin * M,
            bytes_accessed=bytes_accessed,
            transcendentals=0,
        ),
    )(w2d, scale2d, x2d)

    # (Cout, H*W) -> (1, Cout, H, W): free reshape.
    return out2d.reshape(N, Cout, H, W)


if __name__ == "__main__":
    key = jax.random.PRNGKey(0)
    k1, k2, k3 = jax.random.split(key, 3)

    # Shapes from the module's forward: x152 [1,640,14,14], x157 [1,640,1,1]
    N, Cin, H, W = 1, 640, 14, 14
    Cout = 160

    x152 = jax.random.normal(k1, (N, Cin, H, W), dtype=jnp.float32)
    x157 = jax.random.normal(k2, (N, Cin, 1, 1), dtype=jnp.float32)
    # Conv2d(640, 160, 1, 1, bias=False) weight, deterministic init.
    weight = jax.random.normal(k3, (Cout, Cin, 1, 1), dtype=jnp.float32) * 0.02

    # One-time static pre-cast of the weight to bf16 (halves its HBM bytes).
    weight_bf16 = weight.astype(jnp.bfloat16)

    # --- Primary run: f32 activations (what the module's producer supplies). ---
    out = scaled_conv1x1(x157, x152, weight_bf16)
    out = jax.block_until_ready(out)
    assert out.shape == (N, Cout, H, W), out.shape

    x158 = x157 * x152
    # Reference with the same bf16-rounded weight -> tight tolerance check.
    w_eff = weight_bf16.astype(jnp.float32).reshape(Cout, Cin)
    ref = jnp.einsum("nchw,oc->nohw", x158, w_eff)
    err = float(jnp.max(jnp.abs(out - ref)))
    assert jnp.allclose(out, ref, atol=1e-4, rtol=1e-4), err

    # Module-semantics check vs the full-precision f32 weight (only weight
    # rounding differs).
    ref_f32w = jnp.einsum("nchw,oc->nohw", x158, weight.reshape(Cout, Cin))
    err_f32w = float(jnp.max(jnp.abs(out - ref_f32w)))
    assert jnp.allclose(out, ref_f32w, atol=5e-2, rtol=5e-2), err_f32w

    # --- Full-bf16 path (used when the producer emits bf16 activations and the
    # consumer accepts bf16 output); f32 accumulation inside the kernel. ---
    out_bf16 = scaled_conv1x1(
        x157.astype(jnp.bfloat16),
        x152.astype(jnp.bfloat16),
        weight_bf16,
        out_dtype=jnp.bfloat16,
    )
    out_bf16 = jax.block_until_ready(out_bf16)
    err_bf16 = float(jnp.max(jnp.abs(out_bf16.astype(jnp.float32) - ref)))
    assert jnp.allclose(out_bf16.astype(jnp.float32), ref, atol=1.5e-1, rtol=1e-1), err_bf16

    print("KERNEL_OK")
</pallas_src>

<mosaic_0001>
module attributes {stable_mosaic.version = 11 : i64} {
  func.func @scaled_conv1x1_kernel(%arg0: memref<160x640xbf16, #tpu.memory_space<vmem>>, %arg1: memref<1x640xf32, #tpu.memory_space<vmem>>, %arg2: memref<640x196xf32, #tpu.memory_space<vmem>>, %arg3: memref<160x196xf32, #tpu.memory_space<vmem>>) attributes {dimension_semantics = [], scalar_prefetch = 0 : i64, scratch_operands = 0 : i64, tpu.core_type = #tpu.core_type<tc>} {
    %c0 = arith.constant 0 : index
    %c0_0 = arith.constant 0 : index
    %0 = vector.load %arg0[%c0, %c0_0] : memref<160x640xbf16, #tpu.memory_space<vmem>>, vector<160x640xbf16>
    %1 = arith.extf %0 : vector<160x640xbf16> to vector<160x640xf32>
    %c0_1 = arith.constant 0 : index
    %c0_2 = arith.constant 0 : index
    %2 = vector.load %arg1[%c0_1, %c0_2] : memref<1x640xf32, #tpu.memory_space<vmem>>, vector<1x640xf32>
    %3 = vector.broadcast %2 : vector<1x640xf32> to vector<160x640xf32>
    %4 = arith.mulf %1, %3 : vector<160x640xf32>
    %c0_3 = arith.constant 0 : index
    %c0_4 = arith.constant 0 : index
    %5 = vector.load %arg2[%c0_3, %c0_4] : memref<640x196xf32, #tpu.memory_space<vmem>>, vector<640x196xf32>
    %cst = arith.constant dense<0.000000e+00> : vector<160x196xf32>
    %6 = tpu.matmul %4, %5, %cst {dimension_numbers = #tpu.dot_dimension_numbers<[1], [0], [0], [1], [0, 0, 1, 1], [], []>} : vector<160x640xf32>, vector<640x196xf32>, vector<160x196xf32> -> vector<160x196xf32>
    %c0_5 = arith.constant 0 : index
    %c0_6 = arith.constant 0 : index
    %7 = vector.load %arg3[%c0_5, %c0_6] : memref<160x196xf32, #tpu.memory_space<vmem>>, vector<160x196xf32>
    tpu.vector_store %arg3[%c0_5, %c0_6], %6 {strides = array<i32>} : memref<160x196xf32, #tpu.memory_space<vmem>>, vector<160x196xf32>,
    return
  }
}

</mosaic_0001>

<bundles_post_ra>
// kernel: tpu_custom_call.1
= control target key start
LH: loop header
LB: loop body
LE: loop exit
PB: predicated region body
PF: predicated region fallthrough
CT: control target
= control target key end

     0   :  { %s2713_s0 = inlined_call_operand.vmem [shape: bf16[160,640], index: 0, kind: input, shape index: {}]   ;;  %s2714_s1 = inlined_call_operand.vmem [shape: f32[1,640], index: 1, kind: input, shape index: {}]   ;;  %s2715_s2 = inlined_call_operand.vmem [shape: f32[640,196], index: 2, kind: input, shape index: {}]   ;;  %s2716_s3 = inlined_call_operand.hbm [shape: f32[160,196], index: 3, kind: output, shape index: {}]  }
   0x1   :  { %v317_v0 = vld [vmem:[%s2715_s2 + $0xf0] sm:$0xff]  ;;  %v315_v2 = vld [vmem:[%s2715_s2 + $0xe0] sm:$0xff] }
   0x2   :  { %v349_v1 = vld [vmem:[%s2715_s2 + $0x1f0] sm:$0xff]  ;;  %1276 = vmatpush.msra.mxu2 %v317_v0  ;;  %v347_v3 = vld [vmem:[%s2715_s2 + $0x1e0] sm:$0xff]  ;;  %447 = vmatpush.msra.mxu0 %v317_v0 }
   0x3   :  { %1292 = vmatpush.msra.mxu3 %v349_v1  ;;  %v313_v4 = vld [vmem:[%s2715_s2 + $0xd0] sm:$0xff]  ;;  %524 = vmatpush.msra.mxu1 %v349_v1  ;;  %v311_v6 = vld [vmem:[%s2715_s2 + $0xc0] sm:$0xff] }
   0x4   :  { %v345_v5 = vld [vmem:[%s2715_s2 + $0x1d0] sm:$0xff]  ;;  %1277 = vmatpush.msra.mxu2 %v315_v2  ;;  %v343_v7 = vld [vmem:[%s2715_s2 + $0x1c0] sm:$0xff]  ;;  %448 = vmatpush.msra.mxu0 %v315_v2 }
   0x5   :  { %1293 = vmatpush.msra.mxu3 %v347_v3  ;;  %525 = vmatpush.msra.mxu1 %v347_v3  ;;  %v309_v8 = vld [vmem:[%s2715_s2 + $0xb0] sm:$0xff]  ;;  %v307_v10 = vld [vmem:[%s2715_s2 + $0xa0] sm:$0xff] }
   0x6   :  { %1278 = vmatpush.msra.mxu2 %v313_v4  ;;  %v341_v9 = vld [vmem:[%s2715_s2 + $0x1b0] sm:$0xff]  ;;  %449 = vmatpush.msra.mxu0 %v313_v4  ;;  %v339_v11 = vld [vmem:[%s2715_s2 + $0x1a0] sm:$0xff] }
   0x7   :  { %1294 = vmatpush.msra.mxu3 %v345_v5  ;;  %526 = vmatpush.msra.mxu1 %v345_v5  ;;  %v305_v12 = vld [vmem:[%s2715_s2 + $0x90] sm:$0xff]  ;;  %v303_v14 = vld [vmem:[%s2715_s2 + $0x80] sm:$0xff] }
   0x8   :  { %1279 = vmatpush.msra.mxu2 %v311_v6  ;;  %450 = vmatpush.msra.mxu0 %v311_v6  ;;  %v337_v13 = vld [vmem:[%s2715_s2 + $0x190] sm:$0xff]  ;;  %v335_v15 = vld [vmem:[%s2715_s2 + $0x180] sm:$0xff] }
   0x9   :  { %1295 = vmatpush.msra.mxu3 %v343_v7  ;;  %527 = vmatpush.msra.mxu1 %v343_v7  ;;  %v301_v16 = vld [vmem:[%s2715_s2 + $0x70] sm:$0xff]  ;;  %v299_v18 = vld [vmem:[%s2715_s2 + $0x60] sm:$0xff] }
   0xa   :  { %1280 = vmatpush.msra.mxu2 %v309_v8  ;;  %451 = vmatpush.msra.mxu0 %v309_v8  ;;  %v333_v17 = vld [vmem:[%s2715_s2 + $0x170] sm:$0xff]  ;;  %v331_v19 = vld [vmem:[%s2715_s2 + $0x160] sm:$0xff] }
   0xb   :  { %1296 = vmatpush.msra.mxu3 %v341_v9  ;;  %528 = vmatpush.msra.mxu1 %v341_v9  ;;  %v297_v20 = vld [vmem:[%s2715_s2 + $0x50] sm:$0xff] }
   0xc   :  { %1281 = vmatpush.msra.mxu2 %v307_v10  ;;  %452 = vmatpush.msra.mxu0 %v307_v10  ;;  %v329_v21 = vld [vmem:[%s2715_s2 + $0x150] sm:$0xff] }
   0xd   :  { %1297 = vmatpush.msra.mxu3 %v339_v11  ;;  %529 = vmatpush.msra.mxu1 %v339_v11 }
   0xe   :  { %1282 = vmatpush.msra.mxu2 %v305_v12  ;;  %453 = vmatpush.msra.mxu0 %v305_v12 }
   0xf   :  { %1298 = vmatpush.msra.mxu3 %v337_v13  ;;  %530 = vmatpush.msra.mxu1 %v337_v13 }
  0x10   :  { %1283 = vmatpush.msra.mxu2 %v303_v14  ;;  %454 = vmatpush.msra.mxu0 %v303_v14 }
  0x11   :  { %1299 = vmatpush.msra.mxu3 %v335_v15  ;;  %531 = vmatpush.msra.mxu1 %v335_v15 }
  0x12   :  { %1284 = vmatpush.msra.mxu2 %v301_v16  ;;  %455 = vmatpush.msra.mxu0 %v301_v16 }
  0x13   :  { %1300 = vmatpush.msra.mxu3 %v333_v17  ;;  %532 = vmatpush.msra.mxu1 %v333_v17 }
  0x14   :  { %8 = vsyncpa [#allocation3], 0  ;;  %1285 = vmatpush.msra.mxu2 %v299_v18  ;;  %v295_v22 = vld [vmem:[%s2715_s2 + $0x40] sm:$0xff]  ;;  %456 = vmatpush.msra.mxu0 %v299_v18  ;;  %v45_v24 = vld [vmem:[%s2713_s0 + $0xc8] sm:$0xff]  ;;  %vm1218_vm0 = vcmask 556032   ;;  %s1264_s10 = sshll.u32 %s2716_s3, 4  ;;  %s1265_s10 = int_to_ptr.hbm [resolvable:$true] %s1264_s10 }
  0x15   :  { %1301 = vmatpush.msra.mxu3 %v331_v19  ;;  %v327_v23 = vld [vmem:[%s2715_s2 + $0x140] sm:$0xff]  ;;  %533 = vmatpush.msra.mxu1 %v331_v19  ;;  %v293_v26 = vld [vmem:[%s2715_s2 + $0x30] sm:$0xff]  ;;  %v125_v30 = vunpack.c.l.bf16 %v45_v24  ;;  %v126_v32 = vunpack.c.h.bf16 %v45_v24  ;;  %v318_v56 = vld [vmem:[%s2715_s2 + $0xf8] sm:$0xff]  ;;  %s1338_s11 = smov 256   ;;  %s1339_s12 = smov 16  }
  0x16   :  { %1286 = vmatpush.msra.mxu2 %v297_v20  ;;  %v1438_v25 = vld [vmem:[%s2714_s1] sm:$0x1f]  ;;  %v325_v27 = vld [vmem:[%s2715_s2 + $0x130] sm:$0xff]  ;;  %457 = vmatpush.msra.mxu0 %v297_v20  ;;  %v316_v1 = vld [vmem:[%s2715_s2 + $0xe8] sm:$0xff] }
  0x17   :  { %1302 = vmatpush.msra.mxu3 %v329_v21  ;;  %534 = vmatpush.msra.mxu1 %v329_v21  ;;  %v291_v28 = vld [vmem:[%s2715_s2 + $0x20] sm:$0xff]  ;;  %v1453_v31 = vperm.slane %v1438_v25, 0  ;;  %v1456_v33 = vperm.slane %v1438_v25, 1  ;;  %v289_v35 = vld [vmem:[%s2715_s2 + $0x10] sm:$0xff]  ;;  %v314_v9 = vld [vmem:[%s2715_s2 + $0xd8] sm:$0xff] }
  0x18   :  { %1287 = vmatpush.msra.mxu2 %v295_v22  ;;  %v323_v29 = vld [vmem:[%s2715_s2 + $0x120] sm:$0xff]  ;;  %458 = vmatpush.msra.mxu0 %v295_v22  ;;  %v321_v36 = vld [vmem:[%s2715_s2 + $0x110] sm:$0xff]  ;;  %v21_v10 = vld [vmem:[%s2713_s0 + $0x28] sm:$0xff] }
  0x19   :  { %1303 = vmatpush.msra.mxu3 %v327_v23  ;;  %535 = vmatpush.msra.mxu1 %v327_v23  ;;  %v15_v34 = vld [vmem:[%s2713_s0] sm:$0xff]  ;;  %v1474_v39 = vmul.f32 %v1453_v31, %v125_v30  ;;  %v1477_v40 = vmul.f32 %v1456_v33, %v126_v32  ;;  %v381_v44 = vld [vmem:[%s2715_s2 + $0x2f0] sm:$0xff]  ;;  %v312_v14 = vld [vmem:[%s2715_s2 + $0xc8] sm:$0xff]  ;;  %v85_v17 = vunpack.c.l.bf16 %v21_v10  ;;  %v86_v18 = vunpack.c.h.bf16 %v21_v10 }
  0x1a   :  { %1288 = vmatpush.msra.mxu2 %v293_v26  ;;  %459 = vmatpush.msra.mxu0 %v293_v26  ;;  %v287_v37 = vld [vmem:[%s2715_s2] sm:$0xff]  ;;  %v75_v41 = vunpack.c.l.bf16 %v15_v34  ;;  %v76_v42 = vunpack.c.h.bf16 %v15_v34  ;;  %v413_v45 = vld [vmem:[%s2715_s2 + $0x3f0] sm:$0xff]  ;;  %v310_v23 = vld [vmem:[%s2715_s2 + $0xb8] sm:$0xff] }
  0x1b   :  { %1304 = vmatpush.msra.mxu3 %v325_v27  ;;  %536 = vmatpush.msra.mxu1 %v325_v27  ;;  %v319_v38 = vld [vmem:[%s2715_s2 + $0x100] sm:$0xff]  ;;  %2766 = vst [vmem:[#allocation5_spill] sm:$0xff] %v1477_v40  ;;  %v18_v52 = vld [vmem:[%s2713_s0 + $0x14] sm:$0xff]  ;;  %v1610_v30 = vmul.f32 %v1456_v33, %v86_v18  ;;  %v308_v34 = vld [vmem:[%s2715_s2 + $0xa8] sm:$0xff] }
  0x1c   :  { %1289 = vmatpush.msra.mxu2 %v291_v28  ;;  %460 = vmatpush.msra.mxu0 %v291_v28  ;;  %v48_v43 = vld [vmem:[%s2713_s0 + $0xdc] sm:$0xff]  ;;  %v1497_v50 = vmul.f32 %v1453_v31, %v75_v41  ;;  %v1500_v51 = vmul.f32 %v1456_v33, %v76_v42  ;;  %v377_v53 = vld [vmem:[%s2715_s2 + $0x2d0] sm:$0xff]  ;;  %v80_v61 = vunpack.c.l.bf16 %v18_v52  ;;  %v81_v62 = vunpack.c.h.bf16 %v18_v52  ;;  %v54_v21 = vld [vmem:[%s2713_s0 + $0x104] sm:$0xff] }
  0x1d   :  { %1305 = vmatpush.msra.mxu3 %v323_v29  ;;  %537 = vmatpush.msra.mxu1 %v323_v29  ;;  %v379_v46 = vld [vmem:[%s2715_s2 + $0x2e0] sm:$0xff]  ;;  %v130_v48 = vunpack.c.l.bf16 %v48_v43  ;;  %v131_v49 = vunpack.c.h.bf16 %v48_v43  ;;  %v445_v54 = vld [vmem:[%s2715_s2 + $0x4f0] sm:$0xff]  ;;  %v140_v27 = vunpack.c.l.bf16 %v54_v21  ;;  %v141_v28 = vunpack.c.h.bf16 %v54_v21  ;;  %v306_v41 = vld [vmem:[%s2715_s2 + $0x98] sm:$0xff] }
  0x1e   :  { %1290 = vmatpush.msra.mxu2 %v289_v35  ;;  %461 = vmatpush.msra.mxu0 %v289_v35  ;;  %v411_v47 = vld [vmem:[%s2715_s2 + $0x3e0] sm:$0xff]  ;;  %v409_v55 = vld [vmem:[%s2715_s2 + $0x3d0] sm:$0xff]  ;;  %v1549_v6 = vmul.f32 %v1453_v31, %v80_v61  ;;  %v1552_v7 = vmul.f32 %v1456_v33, %v81_v62  ;;  %v1607_v29 = vmul.f32 %v1453_v31, %v85_v17  ;;  %v304_v52 = vld [vmem:[%s2715_s2 + $0x88] sm:$0xff] }
  0x1f   :  { %1306 = vmatpush.msra.mxu3 %v321_v36  ;;  %538 = vmatpush.msra.mxu1 %v321_v36  ;;  %v1518_v57 = vmul.f32 %v1453_v31, %v130_v48  ;;  %v1521_v58 = vmul.f32 %v1456_v33, %v131_v49  ;;  %v375_v59 = vld [vmem:[%s2715_s2 + $0x2c0] sm:$0xff]  ;;  %v51_v63 = vld [vmem:[%s2713_s0 + $0xf0] sm:$0xff]  ;;  %v1634_v42 = vmul.f32 %v1453_v31, %v140_v27  ;;  %v57_v48 = vld [vmem:[%s2713_s0 + $0x118] sm:$0xff] }
  0x20   :  { %1291 = vmatpush.msra.mxu2 %v287_v37  ;;  %462 = vmatpush.msra.mxu0 %v287_v37  ;;  %v443_v60 = vld [vmem:[%s2715_s2 + $0x4e0] sm:$0xff]  ;;  %v373_v2 = vld [vmem:[%s2715_s2 + $0x2b0] sm:$0xff]  ;;  %v135_v4 = vunpack.c.l.bf16 %v51_v63  ;;  %v136_v5 = vunpack.c.h.bf16 %v51_v63  ;;  %v1637_v43 = vmul.f32 %v1456_v33, %v141_v28  ;;  %v302_v62 = vld [vmem:[%s2715_s2 + $0x78] sm:$0xff] }
  0x21   :  { %1307 = vmatpush.msra.mxu3 %v319_v38  ;;  %493 = vmatmul.f32.vlgmr.msra.gmra.mxu2 %v1474_v39  ;;  %2767 = vst [vmem:[#allocation6_spill] sm:$0xff] %v1521_v58  ;;  %v407_v0 = vld [vmem:[%s2715_s2 + $0x3c0] sm:$0xff]  ;;  %v441_v3 = vld [vmem:[%s2715_s2 + $0x4d0] sm:$0xff] }
  0x22   :  { %570 = vmatmul.f32.vlgmr.msra.gmra.mxu3 %v1477_v40  ;;  %601 = vmatpush.msrb.mxu2 %v381_v44  ;;  %v405_v8 = vld [vmem:[%s2715_s2 + $0x3b0] sm:$0xff]  ;;  %v371_v11 = vld [vmem:[%s2715_s2 + $0x2a0] sm:$0xff]  ;;  %v1576_v15 = vmul.f32 %v1453_v31, %v135_v4  ;;  %v1579_v16 = vmul.f32 %v1456_v33, %v136_v5  ;;  %2769 = vst [vmem:[#allocation8_spill] sm:$0xff] %v1637_v43 }
  0x23   :  { %678 = vmatpush.msrb.mxu3 %v413_v45  ;;  %539 = vmatpush.msra.mxu1 %v319_v38  ;;  %v439_v12 = vld [vmem:[%s2715_s2 + $0x4c0] sm:$0xff]  ;;  %v369_v19 = vld [vmem:[%s2715_s2 + $0x290] sm:$0xff] }
  0x24   :  { %602 = vmatpush.msrb.mxu2 %v379_v46  ;;  %463 = vmatmul.f32.vlgmr.msra.gmra.mxu0 %v1497_v50  ;;  %v403_v13 = vld [vmem:[%s2715_s2 + $0x3a0] sm:$0xff]  ;;  %2768 = vst [vmem:[#allocation7_spill] sm:$0xff] %v1579_v16  ;;  %v437_v20 = vld [vmem:[%s2715_s2 + $0x4b0] sm:$0xff] }
  0x25   :  { %679 = vmatpush.msrb.mxu3 %v411_v47  ;;  %540 = vmatmul.f32.vlgmr.msra.gmra.mxu1 %v1500_v51  ;;  %v401_v22 = vld [vmem:[%s2715_s2 + $0x390] sm:$0xff]  ;;  %v367_v24 = vld [vmem:[%s2715_s2 + $0x280] sm:$0xff] }
  0x26   :  { %603 = vmatpush.msrb.mxu2 %v377_v53  ;;  %755 = vmatpush.msrb.mxu0 %v445_v54  ;;  %v435_v26 = vld [vmem:[%s2715_s2 + $0x4a0] sm:$0xff]  ;;  %v365_v36 = vld [vmem:[%s2715_s2 + $0x270] sm:$0xff] }
  0x27   :  { %680 = vmatpush.msrb.mxu3 %v409_v55  ;;  %832 = vmatpush.msrb.mxu1 %v318_v56  ;;  %v399_v32 = vld [vmem:[%s2715_s2 + $0x380] sm:$0xff]  ;;  %v433_v37 = vld [vmem:[%s2715_s2 + $0x490] sm:$0xff]  ;;  %v145_v55 = vunpack.c.l.bf16 %v57_v48  ;;  %v146_v56 = vunpack.c.h.bf16 %v57_v48  ;;  %v294_v48 = vld [vmem:[%s2715_s2 + $0x38] sm:$0xff] }
  0x28   :  { %604 = vmatpush.msrb.mxu2 %v375_v59  ;;  %756 = vmatpush.msrb.mxu0 %v443_v60  ;;  %v24_v35 = vld [vmem:[%s2713_s0 + $0x3c] sm:$0xff]  ;;  %v397_v38 = vld [vmem:[%s2715_s2 + $0x370] sm:$0xff] }
  0x29   :  { %496 = vmatmul.f32.gmra.mxu2 %v1518_v57  ;;  %681 = vmatpush.msrb.mxu3 %v407_v0  ;;  %v90_v44 = vunpack.c.l.bf16 %v24_v35  ;;  %v91_v45 = vunpack.c.h.bf16 %v24_v35  ;;  %v363_v46 = vld [vmem:[%s2715_s2 + $0x260] sm:$0xff]  ;;  %v361_v53 = vld [vmem:[%s2715_s2 + $0x250] sm:$0xff]  ;;  %v1692_v4 = vmul.f32 %v1453_v31, %v145_v55  ;;  %v1695_v5 = vmul.f32 %v1456_v33, %v146_v56 }
  0x2a   :  { %573 = vmatmul.f32.gmra.mxu3 %v1521_v58  ;;  %833 = vmatpush.msrb.mxu1 %v316_v1  ;;  %v431_v47 = vld [vmem:[%s2715_s2 + $0x480] sm:$0xff]  ;;  %v429_v54 = vld [vmem:[%s2715_s2 + $0x470] sm:$0xff] }
  0x2b   :  { %605 = vmatpush.msrb.mxu2 %v373_v2  ;;  %757 = vmatpush.msrb.mxu0 %v441_v3  ;;  %v395_v49 = vld [vmem:[%s2715_s2 + $0x360] sm:$0xff]  ;;  %v1665_v59 = vmul.f32 %v1453_v31, %v90_v44  ;;  %v1668_v60 = vmul.f32 %v1456_v33, %v91_v45  ;;  %v393_v61 = vld [vmem:[%s2715_s2 + $0x350] sm:$0xff]  ;;  %v300_v3 = vld [vmem:[%s2715_s2 + $0x68] sm:$0xff]  ;;  %2770 = vst [vmem:[#allocation9_spill] sm:$0xff] %v1695_v5 }
  0x2c   :  { %682 = vmatpush.msrb.mxu3 %v405_v8  ;;  %834 = vmatpush.msrb.mxu1 %v314_v9  ;;  %v27_v63 = vld [vmem:[%s2713_s0 + $0x50] sm:$0xff]  ;;  %v359_v0 = vld [vmem:[%s2715_s2 + $0x240] sm:$0xff] }
  0x2d   :  { %466 = vmatmul.f32.gmra.mxu0 %v1549_v6  ;;  %543 = vmatmul.f32.gmra.mxu1 %v1552_v7  ;;  %v427_v1 = vld [vmem:[%s2715_s2 + $0x460] sm:$0xff]  ;;  %v95_v8 = vunpack.c.l.bf16 %v27_v63  ;;  %v96_v9 = vunpack.c.h.bf16 %v27_v63  ;;  %v357_v10 = vld [vmem:[%s2715_s2 + $0x230] sm:$0xff] }
  0x2e   :  { %606 = vmatpush.msrb.mxu2 %v371_v11  ;;  %758 = vmatpush.msrb.mxu0 %v439_v12  ;;  %v391_v2 = vld [vmem:[%s2715_s2 + $0x340] sm:$0xff]  ;;  %v425_v11 = vld [vmem:[%s2715_s2 + $0x450] sm:$0xff] }
  0x2f   :  { %683 = vmatpush.msrb.mxu3 %v403_v13  ;;  %835 = vmatpush.msrb.mxu1 %v312_v14  ;;  %v60_v12 = vld [vmem:[%s2713_s0 + $0x12c] sm:$0xff]  ;;  %v298_v14 = vld [vmem:[%s2715_s2 + $0x58] sm:$0xff]  ;;  %v355_v21 = vld [vmem:[%s2715_s2 + $0x220] sm:$0xff] }
  0x30   :  { %607 = vmatpush.msrb.mxu2 %v369_v19  ;;  %759 = vmatpush.msrb.mxu0 %v437_v20  ;;  %v389_v13 = vld [vmem:[%s2715_s2 + $0x330] sm:$0xff]  ;;  %v150_v17 = vunpack.c.l.bf16 %v60_v12  ;;  %v151_v18 = vunpack.c.h.bf16 %v60_v12  ;;  %v1717_v19 = vmul.f32 %v1453_v31, %v95_v8  ;;  %v1720_v20 = vmul.f32 %v1456_v33, %v96_v9  ;;  %v350_v9 = vld [vmem:[%s2715_s2 + $0x1f8] sm:$0xff] }
  0x31   :  { %499 = vmatmul.f32.gmra.mxu2 %v1576_v15  ;;  %684 = vmatpush.msrb.mxu3 %v401_v22  ;;  %v423_v22 = vld [vmem:[%s2715_s2 + $0x440] sm:$0xff]  ;;  %v353_v27 = vld [vmem:[%s2715_s2 + $0x210] sm:$0xff]  ;;  %v382_v12 = vld [vmem:[%s2715_s2 + $0x2f8] sm:$0xff] }
  0x32   :  { %576 = vmatmul.f32.gmra.mxu3 %v1579_v16  ;;  %836 = vmatpush.msrb.mxu1 %v310_v23  ;;  %v387_v23 = vld [vmem:[%s2715_s2 + $0x320] sm:$0xff]  ;;  %v421_v28 = vld [vmem:[%s2715_s2 + $0x430] sm:$0xff] }
  0x33   :  { %608 = vmatpush.msrb.mxu2 %v367_v24  ;;  %760 = vmatpush.msrb.mxu0 %v435_v26  ;;  %v30_v24 = vld [vmem:[%s2713_s0 + $0x64] sm:$0xff]  ;;  %v66_v63 = vld [vmem:[%s2713_s0 + $0x154] sm:$0xff] }
  0x34   :  { %685 = vmatpush.msrb.mxu3 %v399_v32  ;;  %837 = vmatpush.msrb.mxu1 %v308_v34  ;;  %v296_v26 = vld [vmem:[%s2715_s2 + $0x48] sm:$0xff]  ;;  %v1744_v32 = vmul.f32 %v1453_v31, %v150_v17  ;;  %v1747_v34 = vmul.f32 %v1456_v33, %v151_v18  ;;  %v100_v35 = vunpack.c.l.bf16 %v30_v24  ;;  %v417_v8 = vld [vmem:[%s2715_s2 + $0x410] sm:$0xff] }
  0x35   :  { %469 = vmatmul.f32.gmra.mxu0 %v1607_v29  ;;  %546 = vmatmul.f32.gmra.mxu1 %v1610_v30 }
  0x36   :  { %609 = vmatpush.msrb.mxu2 %v365_v36  ;;  %761 = vmatpush.msrb.mxu0 %v433_v37  ;;  %2771 = vst [vmem:[#allocation10_spill] sm:$0xff] %v1747_v34  ;;  %v101_v36 = vunpack.c.h.bf16 %v30_v24  ;;  %v63_v37 = vld [vmem:[%s2713_s0 + $0x140] sm:$0xff]  ;;  %v1760_v45 = vmul.f32 %v1453_v31, %v100_v35  ;;  %v348_v35 = vld [vmem:[%s2715_s2 + $0x1e8] sm:$0xff] }
  0x37   :  { %686 = vmatpush.msrb.mxu3 %v397_v38  ;;  %838 = vmatpush.msrb.mxu1 %v306_v41  ;;  %v33_v38 = vld [vmem:[%s2713_s0 + $0x78] sm:$0xff]  ;;  %v155_v41 = vunpack.c.l.bf16 %v63_v37  ;;  %v156_v44 = vunpack.c.h.bf16 %v63_v37  ;;  %v380_v37 = vld [vmem:[%s2715_s2 + $0x2e8] sm:$0xff] }
  0x38   :  { %610 = vmatpush.msrb.mxu2 %v363_v46  ;;  %762 = vmatpush.msrb.mxu0 %v431_v47  ;;  %v1763_v46 = vmul.f32 %v1456_v33, %v101_v36  ;;  %v385_v47 = vld [vmem:[%s2715_s2 + $0x310] sm:$0xff]  ;;  %v414_v36 = vld [vmem:[%s2715_s2 + $0x3f8] sm:$0xff] }
  0x39   :  { %502 = vmatmul.f32.gmra.mxu2 %v1634_v42  ;;  %687 = vmatpush.msrb.mxu3 %v395_v49  ;;  %v351_v49 = vld [vmem:[%s2715_s2 + $0x200] sm:$0xff]  ;;  %v1784_v55 = vmul.f32 %v1453_v31, %v155_v41  ;;  %v1787_v56 = vmul.f32 %v1456_v33, %v156_v44  ;;  %v446_v41 = vld [vmem:[%s2715_s2 + $0x4f8] sm:$0xff] }
  0x3a   :  { %579 = vmatmul.f32.gmra.mxu3 %v1637_v43  ;;  %839 = vmatpush.msrb.mxu1 %v304_v52  ;;  %v419_v52 = vld [vmem:[%s2715_s2 + $0x420] sm:$0xff] }
  0x3b   :  { %611 = vmatpush.msrb.mxu2 %v361_v53  ;;  %763 = vmatpush.msrb.mxu0 %v429_v54  ;;  %v383_v53 = vld [vmem:[%s2715_s2 + $0x300] sm:$0xff]  ;;  %v292_v54 = vld [vmem:[%s2715_s2 + $0x28] sm:$0xff]  ;;  %2772 = vst [vmem:[#allocation11_spill] sm:$0xff] %v1787_v56 }
  0x3c   :  { %688 = vmatpush.msrb.mxu3 %v393_v61  ;;  %840 = vmatpush.msrb.mxu1 %v302_v62  ;;  %v105_v61 = vunpack.c.l.bf16 %v33_v38  ;;  %v106_v62 = vunpack.c.h.bf16 %v33_v38  ;;  %v39_v38 = vld [vmem:[%s2713_s0 + $0xa0] sm:$0xff] }
  0x3d   :  { %472 = vmatmul.f32.gmra.mxu0 %v1665_v59  ;;  %549 = vmatmul.f32.gmra.mxu1 %v1668_v60 }
  0x3e   :  { %612 = vmatpush.msrb.mxu2 %v359_v0  ;;  %764 = vmatpush.msrb.mxu0 %v427_v1  ;;  %v160_v0 = vunpack.c.l.bf16 %v66_v63  ;;  %v161_v1 = vunpack.c.h.bf16 %v66_v63  ;;  %v346_v63 = vld [vmem:[%s2715_s2 + $0x1d8] sm:$0xff] }
  0x3f   :  { %689 = vmatpush.msrb.mxu3 %v391_v2  ;;  %841 = vmatpush.msrb.mxu1 %v300_v3  ;;  %v1797_v2 = vmul.f32 %v1453_v31, %v105_v61  ;;  %v1800_v3 = vmul.f32 %v1456_v33, %v106_v62 }
  0x40   :  { %613 = vmatpush.msrb.mxu2 %v357_v10  ;;  %765 = vmatpush.msrb.mxu0 %v425_v11  ;;  %v290_v10 = vld [vmem:[%s2715_s2 + $0x18] sm:$0xff]  ;;  %v36_v11 = vld [vmem:[%s2713_s0 + $0x8c] sm:$0xff]  ;;  %v1824_v17 = vmul.f32 %v1453_v31, %v160_v0  ;;  %v1827_v18 = vmul.f32 %v1456_v33, %v161_v1 }
  0x41   :  { %505 = vmatmul.f32.gmra.mxu2 %v1692_v4  ;;  %690 = vmatpush.msrb.mxu3 %v389_v13  ;;  %2773 = vst [vmem:[#allocation12_spill] sm:$0xff] %v1800_v3  ;;  %v415_v13 = vld [vmem:[%s2715_s2 + $0x400] sm:$0xff]  ;;  %v412_v0 = vld [vmem:[%s2715_s2 + $0x3e8] sm:$0xff]  ;;  %v378_v1 = vld [vmem:[%s2715_s2 + $0x2d8] sm:$0xff] }
  0x42   :  { %582 = vmatmul.f32.gmra.mxu3 %v1695_v5  ;;  %842 = vmatpush.msrb.mxu1 %v298_v14  ;;  %v288_v14 = vld [vmem:[%s2715_s2 + $0x8] sm:$0xff]  ;;  %2774 = vst [vmem:[#allocation13_spill] sm:$0xff] %v1827_v18 }
  0x43   :  { %614 = vmatpush.msrb.mxu2 %v355_v21  ;;  %766 = vmatpush.msrb.mxu0 %v423_v22  ;;  %v110_v21 = vunpack.c.l.bf16 %v36_v11  ;;  %v111_v22 = vunpack.c.h.bf16 %v36_v11 }
  0x44   :  { %691 = vmatpush.msrb.mxu3 %v387_v23  ;;  %843 = vmatpush.msrb.mxu1 %v296_v26  ;;  %v69_v23 = vld [vmem:[%s2713_s0 + $0x168] sm:$0xff] }
  0x45   :  { %475 = vmatmul.f32.gmra.mxu0 %v1717_v19  ;;  %552 = vmatmul.f32.gmra.mxu1 %v1720_v20  ;;  %v165_v24 = vunpack.c.l.bf16 %v69_v23  ;;  %v166_v26 = vunpack.c.h.bf16 %v69_v23 }
  0x46   :  { %615 = vmatpush.msrb.mxu2 %v353_v27  ;;  %767 = vmatpush.msrb.mxu0 %v421_v28  ;;  %v1837_v27 = vmul.f32 %v1453_v31, %v110_v21  ;;  %v1840_v28 = vmul.f32 %v1456_v33, %v111_v22  ;;  %v1903_v22 = vperm.slane %v1438_v25, 2 }
  0x47   :  { %692 = vmatpush.msrb.mxu3 %v385_v47  ;;  %844 = vmatpush.msrb.mxu1 %v294_v48  ;;  %v1858_v44 = vmul.f32 %v1453_v31, %v165_v24  ;;  %v1861_v47 = vmul.f32 %v1456_v33, %v166_v26  ;;  %v115_v48 = vunpack.c.l.bf16 %v39_v38 }
  0x48   :  { %616 = vmatpush.msrb.mxu2 %v351_v49  ;;  %768 = vmatpush.msrb.mxu0 %v419_v52  ;;  %2775 = vst [vmem:[#allocation14_spill] sm:$0xff] %v1840_v28  ;;  %v116_v49 = vunpack.c.h.bf16 %v39_v38  ;;  %v72_v52 = vld [vmem:[%s2713_s0 + $0x17c] sm:$0xff] }
  0x49   :  { %508 = vmatmul.f32.gmra.mxu2 %v1744_v32  ;;  %693 = vmatpush.msrb.mxu3 %v383_v53  ;;  %2776 = vst [vmem:[#allocation15_spill] sm:$0xff] %v1861_v47  ;;  %v170_v53 = vunpack.c.l.bf16 %v72_v52  ;;  %v1871_v61 = vmul.f32 %v1453_v31, %v115_v48  ;;  %v1934_v48 = vperm.slane %v1438_v25, 4 }
  0x4a   :  { %585 = vmatmul.f32.gmra.mxu3 %v1747_v34  ;;  %845 = vmatpush.msrb.mxu1 %v292_v54  ;;  %v171_v54 = vunpack.c.h.bf16 %v72_v52  ;;  %v1874_v62 = vmul.f32 %v1456_v33, %v116_v49  ;;  %v19_v49 = vld [vmem:[%s2713_s0 + $0x1c] sm:$0xff] }
  0x4b   :  { %769 = vmatpush.msrb.mxu0 %v417_v8  ;;  %909 = vmatpush.msra.mxu2 %v350_v9  ;;  %v42_v8 = vld [vmem:[%s2713_s0 + $0xb4] sm:$0xff]  ;;  %v444_v9 = vld [vmem:[%s2715_s2 + $0x4e8] sm:$0xff]  ;;  %v82_v52 = vunpack.c.l.bf16 %v19_v49 }
  0x4c   :  { %846 = vmatpush.msrb.mxu1 %v290_v10  ;;  %986 = vmatpush.msra.mxu3 %v382_v12  ;;  %2777 = vst [vmem:[#allocation16_spill] sm:$0xff] %v1874_v62  ;;  %v1892_v10 = vmul.f32 %v1453_v31, %v170_v53  ;;  %v1895_v11 = vmul.f32 %v1456_v33, %v171_v54  ;;  %v16_v12 = vld [vmem:[%s2713_s0 + $0x8] sm:$0xff]  ;;  %v83_v53 = vunpack.c.h.bf16 %v19_v49 }
  0x4d   :  { %478 = vmatmul.f32.gmra.mxu0 %v1760_v45  ;;  %555 = vmatmul.f32.gmra.mxu1 %v1763_v46  ;;  %v77_v21 = vunpack.c.l.bf16 %v16_v12  ;;  %v78_v26 = vunpack.c.h.bf16 %v16_v12  ;;  %v22_v12 = vld [vmem:[%s2713_s0 + $0x30] sm:$0xff] }
  0x4e   :  { %770 = vmatpush.msrb.mxu0 %v415_v13  ;;  %847 = vmatpush.msrb.mxu1 %v288_v14  ;;  %2778 = vst [vmem:[#allocation17_spill] sm:$0xff] %v1895_v11  ;;  %v120_v13 = vunpack.c.l.bf16 %v42_v8  ;;  %v121_v14 = vunpack.c.h.bf16 %v42_v8 }
  0x4f   :  { %910 = vmatpush.msra.mxu2 %v348_v35  ;;  %987 = vmatpush.msra.mxu3 %v380_v37  ;;  %v1914_v35 = vperm.slane %v1438_v25, 3  ;;  %v410_v37 = vld [vmem:[%s2715_s2 + $0x3d8] sm:$0xff] }
  0x50   :  { %1063 = vmatpush.msra.mxu0 %v414_v36  ;;  %1140 = vmatpush.msra.mxu1 %v446_v41  ;;  %v1908_v23 = vmul.f32 %v1453_v31, %v120_v13  ;;  %v1911_v24 = vmul.f32 %v1456_v33, %v121_v14  ;;  %v344_v36 = vld [vmem:[%s2715_s2 + $0x1c8] sm:$0xff]  ;;  %v17_v31 = vld [vmem:[%s2713_s0 + $0x10] sm:$0xf]  ;;  %v1926_v33 = vmul.f32 %v1903_v22, %v77_v21  ;;  %v442_v25 = vld [vmem:[%s2715_s2 + $0x4d8] sm:$0xff]  ;;  %v87_v13 = vunpack.c.l.bf16 %v22_v12 }
  0x51   :  { %511 = vmatmul.f32.gmra.mxu2 %v1784_v55  ;;  %988 = vmatpush.msra.mxu3 %v378_v1  ;;  %v1931_v38 = vmul.f32 %v1914_v35, %v78_v26  ;;  %v79_v41 = vunpack.c.l.bf16 %v17_v31  ;;  %v1954_v1 = vmul.f32 %v1903_v22, %v82_v52  ;;  %v1957_v8 = vmul.f32 %v1914_v35, %v83_v53  ;;  %v342_v26 = vld [vmem:[%s2715_s2 + $0x1b8] sm:$0xff]  ;;  %v440_v31 = vld [vmem:[%s2715_s2 + $0x4c8] sm:$0xff] }
  0x52   :  { %588 = vmatmul.f32.gmra.mxu3 %v1787_v56  ;;  %911 = vmatpush.msra.mxu2 %v346_v63  ;;  %2779 = vst [vmem:[#allocation18_spill] sm:$0xff] %v1911_v24  ;;  %v376_v63 = vld [vmem:[%s2715_s2 + $0x2c8] sm:$0xff]  ;;  %v88_v14 = vunpack.c.h.bf16 %v22_v12 }
  0x53   :  { %1064 = vmatpush.msra.mxu0 %v412_v0  ;;  %1141 = vmatpush.msra.mxu1 %v444_v9  ;;  %v1942_v54 = vmul.f32 %v1934_v48, %v79_v41  ;;  %v20_v0 = vld [vmem:[%s2713_s0 + $0x24] sm:$0xf]  ;;  %v1985_v41 = vmul.f32 %v1903_v22, %v87_v13  ;;  %v26_v12 = vld [vmem:[%s2713_s0 + $0x4c] sm:$0xf] }
  0x54   :  { %912 = vmatpush.msra.mxu2 %v344_v36  ;;  %989 = vmatpush.msra.mxu3 %v376_v63  ;;  %v84_v9 = vunpack.c.l.bf16 %v20_v0  ;;  %v374_v36 = vld [vmem:[%s2715_s2 + $0x2b8] sm:$0xff]  ;;  %v1988_v49 = vmul.f32 %v1914_v35, %v88_v14  ;;  %v25_v53 = vld [vmem:[%s2713_s0 + $0x44] sm:$0xff] }
  0x55   :  { %481 = vmatmul.f32.gmra.mxu0 %v1797_v2  ;;  %558 = vmatmul.f32.gmra.mxu1 %v1800_v3  ;;  %v92_v63 = vunpack.c.l.bf16 %v25_v53 }
  0x56   :  { %1065 = vmatpush.msra.mxu0 %v410_v37  ;;  %1142 = vmatpush.msra.mxu1 %v442_v25  ;;  %v1967_v21 = vmul.f32 %v1934_v48, %v84_v9  ;;  %v23_v37 = vld [vmem:[%s2713_s0 + $0x38] sm:$0xf]  ;;  %v93_v25 = vunpack.c.h.bf16 %v25_v53  ;;  %v340_v9 = vld [vmem:[%s2715_s2 + $0x1a8] sm:$0xff]  ;;  %v29_v53 = vld [vmem:[%s2713_s0 + $0x60] sm:$0xf] }
  0x57   :  { %913 = vmatpush.msra.mxu2 %v342_v26  ;;  %990 = vmatpush.msra.mxu3 %v374_v36  ;;  %v89_v52 = vunpack.c.l.bf16 %v23_v37  ;;  %v2010_v13 = vmul.f32 %v1903_v22, %v92_v63  ;;  %v94_v26 = vunpack.c.l.bf16 %v26_v12  ;;  %v438_v36 = vld [vmem:[%s2715_s2 + $0x4b8] sm:$0xff]  ;;  %v404_v12 = vld [vmem:[%s2715_s2 + $0x3a8] sm:$0xff] }
  0x58   :  { %1143 = vmatpush.msra.mxu1 %v440_v31  ;;  %v2013_v14 = vmul.f32 %v1914_v35, %v93_v25  ;;  %v28_v37 = vld [vmem:[%s2713_s0 + $0x58] sm:$0xff] }
  0x59   :  { %514 = vmatmul.f32.gmra.mxu2 %v1824_v17  ;;  %v1998_v0 = vmul.f32 %v1934_v48, %v89_v52  ;;  %v98_v31 = vunpack.c.h.bf16 %v28_v37  ;;  %v2029_v52 = vmul.f32 %v1934_v48, %v94_v26  ;;  %v370_v26 = vld [vmem:[%s2715_s2 + $0x298] sm:$0xff] }
  0x5a   :  { %591 = vmatmul.f32.gmra.mxu3 %v1827_v18  ;;  %914 = vmatpush.msra.mxu2 %v340_v9  ;;  %v99_v9 = vunpack.c.l.bf16 %v29_v53 }
  0x5b   :  { %1144 = vmatpush.msra.mxu1 %v438_v36  ;;  %v2038_v25 = vmul.f32 %v1914_v35, %v98_v31  ;;  %v32_v31 = vld [vmem:[%s2713_s0 + $0x74] sm:$0xf] }
  0x5d   :  { %484 = vmatmul.f32.gmra.mxu0 %v1837_v27  ;;  %561 = vmatmul.f32.gmra.mxu1 %v1840_v28 }
  0x61   :  { %517 = vmatmul.f32.gmra.mxu2 %v1858_v44 }
  0x62   :  { %594 = vmatmul.f32.gmra.mxu3 %v1861_v47 }
  0x65   :  { %487 = vmatmul.f32.gmra.mxu0 %v1871_v61  ;;  %564 = vmatmul.f32.gmra.mxu1 %v1874_v62 }
  0x69   :  { %520 = vmatmul.f32.gmra.mxu2 %v1892_v10 }
  0x6a   :  { %597 = vmatmul.f32.gmra.mxu3 %v1895_v11  ;;  %v37_v11 = vld [vmem:[%s2713_s0 + $0x94] sm:$0xff] }
  0x6d   :  { %490 = vmatmul.f32.gmra.mxu0 %v1908_v23  ;;  %567 = vmatmul.f32.gmra.mxu1 %v1911_v24 }
  0x71   :  { %617 = vmatmul.f32.vlgmr.msrb.gmra.mxu2 %v1926_v33 }
  0x72   :  { %694 = vmatmul.f32.vlgmr.msrb.gmra.mxu3 %v1931_v38 }
  0x75   :  { %771 = vmatmul.f32.vlgmr.msrb.gmra.mxu0 %v1942_v54  ;;  %848 = vmatmul.f32.vlgmr.msrb.gmra.mxu1 %v1497_v50  ;;  %v408_v50 = vld [vmem:[%s2715_s2 + $0x3c8] sm:$0xff] }
  0x76   :  { %1066 = vmatpush.msra.mxu0 %v408_v50  ;;  %v372_v50 = vld [vmem:[%s2715_s2 + $0x2a8] sm:$0xff] }
  0x77   :  { %991 = vmatpush.msra.mxu3 %v372_v50  ;;  %v31_v50 = vld [vmem:[%s2713_s0 + $0x6c] sm:$0xff] }
  0x78   :  { %v102_v36 = vunpack.c.l.bf16 %v31_v50 }
  0x79   :  { %620 = vmatmul.f32.gmra.mxu2 %v1954_v1  ;;  %992 = vmatpush.msra.mxu3 %v370_v26  ;;  %v402_v26 = vld [vmem:[%s2715_s2 + $0x398] sm:$0xff] }
  0x7a   :  { %697 = vmatmul.f32.gmra.mxu3 %v1957_v8  ;;  %v2066_v53 = vmul.f32 %v1903_v22, %v102_v36 }
  0x7d   :  { %774 = vmatmul.f32.gmra.mxu0 %v1967_v21  ;;  %851 = vmatmul.f32.gmra.mxu1 %v1549_v6  ;;  %v406_v6 = vld [vmem:[%s2715_s2 + $0x3b8] sm:$0xff] }
  0x7e   :  { %1067 = vmatpush.msra.mxu0 %v406_v6  ;;  %v338_v6 = vld [vmem:[%s2715_s2 + $0x198] sm:$0xff] }
  0x7f   :  { %915 = vmatpush.msra.mxu2 %v338_v6 }
  0x80   :  { %1068 = vmatpush.msra.mxu0 %v404_v12  ;;  %v104_v12 = vunpack.c.l.bf16 %v32_v31  ;;  %v434_v31 = vld [vmem:[%s2715_s2 + $0x498] sm:$0xff] }
  0x81   :  { %623 = vmatmul.f32.gmra.mxu2 %v1985_v41 }
  0x82   :  { %700 = vmatmul.f32.gmra.mxu3 %v1988_v49  ;;  %1069 = vmatpush.msra.mxu0 %v402_v26  ;;  %v2085_v36 = vmul.f32 %v1934_v48, %v104_v12 }
  0x84   :  { %2781 = vst [vmem:[#allocation20_spill] sm:$0xff] %v2085_v36 }
  0x85   :  { %777 = vmatmul.f32.gmra.mxu0 %v1998_v0  ;;  %854 = vmatmul.f32.gmra.mxu1 %v1607_v29  ;;  %v97_v29 = vunpack.c.l.bf16 %v28_v37  ;;  %v103_v37 = vunpack.c.h.bf16 %v31_v50  ;;  %v34_v50 = vld [vmem:[%s2713_s0 + $0x80] sm:$0xff] }
  0x87   :  { %v2035_v63 = vmul.f32 %v1903_v22, %v97_v29  ;;  %v2060_v29 = vmul.f32 %v1934_v48, %v99_v9  ;;  %v2069_v6 = vmul.f32 %v1914_v35, %v103_v37  ;;  %v336_v9 = vld [vmem:[%s2715_s2 + $0x188] sm:$0xff] }
  0x88   :  { %916 = vmatpush.msra.mxu2 %v336_v9  ;;  %v368_v37 = vld [vmem:[%s2715_s2 + $0x288] sm:$0xff] }
  0x89   :  { %626 = vmatmul.f32.gmra.mxu2 %v2010_v13  ;;  %2780 = vst [vmem:[#allocation19_spill] sm:$0xff] %v2069_v6  ;;  %v35_v9 = vld [vmem:[%s2713_s0 + $0x88] sm:$0xf]  ;;  %993 = vmatpush.msra.mxu3 %v368_v37  ;;  %v112_v37 = vunpack.c.l.bf16 %v37_v11 }
  0x8a   :  { %703 = vmatmul.f32.gmra.mxu3 %v2013_v14 }
  0x8b   :  { %v2134_v43 = vmul.f32 %v1903_v22, %v112_v37 }
  0x8d   :  { %780 = vmatmul.f32.gmra.mxu0 %v2029_v52  ;;  %857 = vmatmul.f32.gmra.mxu1 %v1665_v59  ;;  %v436_v59 = vld [vmem:[%s2715_s2 + $0x4a8] sm:$0xff]  ;;  %2786 = vst [vmem:[#allocation25_spill] sm:$0xff] %v2134_v43 }
  0x8e   :  { %1145 = vmatpush.msra.mxu1 %v436_v59  ;;  %v108_v59 = vunpack.c.h.bf16 %v34_v50 }
  0x90   :  { %1146 = vmatpush.msra.mxu1 %v434_v31  ;;  %v2100_v12 = vmul.f32 %v1914_v35, %v108_v59  ;;  %v113_v31 = vunpack.c.h.bf16 %v37_v11  ;;  %v334_v59 = vld [vmem:[%s2715_s2 + $0x178] sm:$0xff] }
  0x91   :  { %629 = vmatmul.f32.gmra.mxu2 %v2035_v63  ;;  %v38_v11 = vld [vmem:[%s2713_s0 + $0x9c] sm:$0xf] }
  0x92   :  { %706 = vmatmul.f32.gmra.mxu3 %v2038_v25  ;;  %2783 = vst [vmem:[#allocation22_spill] sm:$0xff] %v2100_v12  ;;  %917 = vmatpush.msra.mxu2 %v334_v59  ;;  %v2137_v16 = vmul.f32 %v1914_v35, %v113_v31  ;;  %v114_v59 = vunpack.c.l.bf16 %v38_v11  ;;  %v332_v31 = vld [vmem:[%s2715_s2 + $0x168] sm:$0xff] }
  0x94   :  { %2787 = vst [vmem:[#allocation26_spill] sm:$0xff] %v2137_v16  ;;  %v2147_v37 = vmul.f32 %v1934_v48, %v114_v59  ;;  %918 = vmatpush.msra.mxu2 %v332_v31  ;;  %v364_v31 = vld [vmem:[%s2715_s2 + $0x268] sm:$0xff] }
  0x95   :  { %783 = vmatmul.f32.gmra.mxu0 %v2060_v29  ;;  %860 = vmatmul.f32.gmra.mxu1 %v1717_v19  ;;  %v107_v19 = vunpack.c.l.bf16 %v34_v50  ;;  %v109_v50 = vunpack.c.l.bf16 %v35_v9  ;;  %v366_v9 = vld [vmem:[%s2715_s2 + $0x278] sm:$0xff] }
  0x96   :  { %994 = vmatpush.msra.mxu3 %v366_v9  ;;  %2788 = vst [vmem:[#allocation27_spill] sm:$0xff] %v2147_v37 }
  0x97   :  { %v2097_v26 = vmul.f32 %v1903_v22, %v107_v19  ;;  %v2110_v19 = vmul.f32 %v1934_v48, %v109_v50  ;;  %v432_v50 = vld [vmem:[%s2715_s2 + $0x488] sm:$0xff] }
  0x98   :  { %1147 = vmatpush.msra.mxu1 %v432_v50  ;;  %v41_v50 = vld [vmem:[%s2713_s0 + $0xb0] sm:$0xf]  ;;  %995 = vmatpush.msra.mxu3 %v364_v31 }
  0x99   :  { %632 = vmatmul.f32.gmra.mxu2 %v2066_v53  ;;  %2782 = vst [vmem:[#allocation21_spill] sm:$0xff] %v2097_v26  ;;  %v119_v62 = vunpack.c.l.bf16 %v41_v50 }
  0x9a   :  { %709 = vmatmul.f32.gmra.mxu3 %v2069_v6  ;;  %2784 = vst [vmem:[#allocation23_spill] sm:$0xff] %v2110_v19 }
  0x9b   :  { %v2184_v50 = vmul.f32 %v1934_v48, %v119_v62 }
  0x9d   :  { %786 = vmatmul.f32.gmra.mxu0 %v2085_v36  ;;  %863 = vmatmul.f32.gmra.mxu1 %v1760_v45  ;;  %v400_v45 = vld [vmem:[%s2715_s2 + $0x388] sm:$0xff]  ;;  %2792 = vst [vmem:[#allocation31_spill] sm:$0xff] %v2184_v50  ;;  %v67_v36 = vld [vmem:[%s2713_s0 + $0x15c] sm:$0xff] }
  0x9e   :  { %1070 = vmatpush.msra.mxu0 %v400_v45  ;;  %v40_v45 = vld [vmem:[%s2713_s0 + $0xa8] sm:$0xff] }
  0xa1   :  { %635 = vmatmul.f32.gmra.mxu2 %v2097_v26  ;;  %v2121_v47 = vpop.f32.mrf.mxu0 }
  0xa2   :  { %712 = vmatmul.f32.gmra.mxu3 %v2100_v12  ;;  %v2123_v18 = vpop.f32.mrf.mxu1 }
  0xa4   :  { %v494_v56 = vpop.f32.mrf.mxu2 }
  0xa5   :  { %v571_v34 = vpop.f32.mrf.mxu3  ;;  %789 = vmatmul.f32.gmra.mxu0 %v2110_v19  ;;  %866 = vmatmul.f32.gmra.mxu1 %v1797_v2  ;;  %v398_v2 = vld [vmem:[%s2715_s2 + $0x378] sm:$0xff] }
  0xa6   :  { %v2131_v5 = vadd.f32 %v571_v34, %v494_v56  ;;  %v117_v34 = vunpack.c.l.bf16 %v40_v45  ;;  %v118_v56 = vunpack.c.h.bf16 %v40_v45  ;;  %1071 = vmatpush.msra.mxu0 %v398_v2  ;;  %v430_v2 = vld [vmem:[%s2715_s2 + $0x478] sm:$0xff] }
  0xa7   :  { %1148 = vmatpush.msra.mxu1 %v430_v2 }
  0xa8   :  { %2785 = vst [vmem:[#allocation24_spill] sm:$0xff] %v2131_v5  ;;  %v2165_v40 = vmul.f32 %v1903_v22, %v117_v34  ;;  %v2168_v24 = vmul.f32 %v1914_v35, %v118_v56  ;;  %v43_v34 = vld [vmem:[%s2713_s0 + $0xbc] sm:$0xff] }
  0xa9   :  { %638 = vmatmul.f32.gmra.mxu2 %v2134_v43  ;;  %v123_v56 = vunpack.c.h.bf16 %v43_v34 }
  0xaa   :  { %715 = vmatmul.f32.gmra.mxu3 %v2137_v16  ;;  %v2155_v9 = vpop.f32.mrf.mxu0  ;;  %v2157_v11 = vpop.f32.mrf.mxu1  ;;  %2790 = vst [vmem:[#allocation29_spill] sm:$0xff] %v2165_v40 }
  0xab   :  { %2791 = vst [vmem:[#allocation30_spill] sm:$0xff] %v2168_v24 }
  0xac   :  { %v497_v59 = vpop.f32.mrf.mxu2 }
  0xad   :  { %v574_v45 = vpop.f32.mrf.mxu3  ;;  %792 = vmatmul.f32.gmra.mxu0 %v2147_v37  ;;  %869 = vmatmul.f32.gmra.mxu1 %v1837_v27  ;;  %v122_v27 = vunpack.c.l.bf16 %v43_v34  ;;  %v44_v37 = vld [vmem:[%s2713_s0 + $0xc4] sm:$0xf]  ;;  %v2199_v34 = vmul.f32 %v1914_v35, %v123_v56  ;;  %v46_v56 = vld [vmem:[%s2713_s0 + $0xd0] sm:$0xff] }
  0xae   :  { %v2162_v58 = vadd.f32 %v574_v45, %v497_v59  ;;  %v124_v62 = vunpack.c.l.bf16 %v44_v37  ;;  %v127_v37 = vunpack.c.l.bf16 %v46_v56 }
  0xaf   :  { %2795 = vst [vmem:[#allocation34_spill] sm:$0xff] %v2199_v34 }
  0xb0   :  { %2789 = vst [vmem:[#allocation28_spill] sm:$0xff] %v2162_v58 }
  0xb1   :  { %641 = vmatmul.f32.gmra.mxu2 %v2165_v40  ;;  %v2196_v40 = vmul.f32 %v1903_v22, %v122_v27  ;;  %v362_v27 = vld [vmem:[%s2715_s2 + $0x258] sm:$0xff] }
  0xb2   :  { %718 = vmatmul.f32.gmra.mxu3 %v2168_v24  ;;  %v2186_v59 = vpop.f32.mrf.mxu0  ;;  %v2188_v45 = vpop.f32.mrf.mxu1  ;;  %v330_v24 = vld [vmem:[%s2715_s2 + $0x158] sm:$0xff] }
  0xb3   :  { %2794 = vst [vmem:[#allocation33_spill] sm:$0xff] %v2196_v40  ;;  %919 = vmatpush.msra.mxu2 %v330_v24  ;;  %996 = vmatpush.msra.mxu3 %v362_v27  ;;  %v47_v24 = vld [vmem:[%s2713_s0 + $0xd8] sm:$0xf] }
  0xb4   :  { %v500_v16 = vpop.f32.mrf.mxu2 }
  0xb5   :  { %v577_v31 = vpop.f32.mrf.mxu3  ;;  %795 = vmatmul.f32.gmra.mxu0 %v2184_v50  ;;  %872 = vmatmul.f32.gmra.mxu1 %v1871_v61  ;;  %v428_v61 = vld [vmem:[%s2715_s2 + $0x468] sm:$0xff]  ;;  %v2221_v50 = vmul.f32 %v1934_v48, %v124_v62  ;;  %v129_v62 = vunpack.c.l.bf16 %v47_v24 }
  0xb6   :  { %v2193_v2 = vadd.f32 %v577_v31, %v500_v16  ;;  %v396_v16 = vld [vmem:[%s2715_s2 + $0x368] sm:$0xff]  ;;  %1149 = vmatpush.msra.mxu1 %v428_v61  ;;  %v128_v31 = vunpack.c.h.bf16 %v46_v56 }
  0xb7   :  { %1072 = vmatpush.msra.mxu0 %v396_v16  ;;  %2796 = vst [vmem:[#allocation35_spill] sm:$0xff] %v2221_v50  ;;  %v2252_v24 = vmul.f32 %v1934_v48, %v129_v62 }
  0xb8   :  { %2793 = vst [vmem:[#allocation32_spill] sm:$0xff] %v2193_v2  ;;  %v2236_v56 = vmul.f32 %v1914_v35, %v128_v31 }
  0xb9   :  { %644 = vmatmul.f32.gmra.mxu2 %v2196_v40  ;;  %v2233_v40 = vmul.f32 %v1903_v22, %v127_v37  ;;  %v49_v37 = vld [vmem:[%s2713_s0 + $0xe4] sm:$0xff]  ;;  %2800 = vst [vmem:[#allocation39_spill] sm:$0xff] %v2252_v24 }
  0xba   :  { %721 = vmatmul.f32.gmra.mxu3 %v2199_v34  ;;  %v2223_v2 = vpop.f32.mrf.mxu0  ;;  %v2225_v58 = vpop.f32.mrf.mxu1  ;;  %2799 = vst [vmem:[#allocation38_spill] sm:$0xff] %v2236_v56  ;;  %v328_v34 = vld [vmem:[%s2715_s2 + $0x148] sm:$0xff]  ;;  %v133_v31 = vunpack.c.h.bf16 %v49_v37 }
  0xbb   :  { %2798 = vst [vmem:[#allocation37_spill] sm:$0xff] %v2233_v40  ;;  %920 = vmatpush.msra.mxu2 %v328_v34 }
  0xbc   :  { %v503_v16 = vpop.f32.mrf.mxu2  ;;  %v2273_v43 = vmul.f32 %v1914_v35, %v133_v31  ;;  %v326_v31 = vld [vmem:[%s2715_s2 + $0x138] sm:$0xff] }
  0xbd   :  { %v580_v27 = vpop.f32.mrf.mxu3  ;;  %798 = vmatmul.f32.gmra.mxu0 %v2221_v50  ;;  %875 = vmatmul.f32.gmra.mxu1 %v1908_v23  ;;  %v132_v23 = vunpack.c.l.bf16 %v49_v37  ;;  %v426_v50 = vld [vmem:[%s2715_s2 + $0x458] sm:$0xff] }
  0xbe   :  { %v2230_v61 = vadd.f32 %v580_v27, %v503_v16  ;;  %v394_v16 = vld [vmem:[%s2715_s2 + $0x358] sm:$0xff]  ;;  %v360_v27 = vld [vmem:[%s2715_s2 + $0x248] sm:$0xff]  ;;  %1150 = vmatpush.msra.mxu1 %v426_v50  ;;  %2803 = vst [vmem:[#allocation42_spill] sm:$0xff] %v2273_v43  ;;  %921 = vmatpush.msra.mxu2 %v326_v31 }
  0xbf   :  { %1073 = vmatpush.msra.mxu0 %v394_v16  ;;  %v50_v16 = vld [vmem:[%s2713_s0 + $0xec] sm:$0xf]  ;;  %997 = vmatpush.msra.mxu3 %v360_v27  ;;  %v52_v27 = vld [vmem:[%s2713_s0 + $0xf8] sm:$0xff] }
  0xc0   :  { %2797 = vst [vmem:[#allocation36_spill] sm:$0xff] %v2230_v61  ;;  %v134_v28 = vunpack.c.l.bf16 %v50_v16  ;;  %v137_v50 = vunpack.c.l.bf16 %v52_v27  ;;  %v358_v16 = vld [vmem:[%s2715_s2 + $0x238] sm:$0xff] }
  0xc1   :  { %647 = vmatmul.f32.gmra.mxu2 %v2233_v40  ;;  %v2270_v40 = vmul.f32 %v1903_v22, %v132_v23  ;;  %998 = vmatpush.msra.mxu3 %v358_v16 }
  0xc2   :  { %724 = vmatmul.f32.gmra.mxu3 %v2236_v56  ;;  %v2260_v61 = vpop.f32.mrf.mxu0  ;;  %v2262_v34 = vpop.f32.mrf.mxu1  ;;  %v2283_v23 = vmul.f32 %v1934_v48, %v134_v28  ;;  %v53_v28 = vld [vmem:[%s2713_s0 + $0x100] sm:$0xf]  ;;  %v2307_v19 = vmul.f32 %v1903_v22, %v137_v50 }
  0xc3   :  { %2802 = vst [vmem:[#allocation41_spill] sm:$0xff] %v2270_v40  ;;  %v139_v31 = vunpack.c.l.bf16 %v53_v28 }
  0xc4   :  { %v506_v62 = vpop.f32.mrf.mxu2  ;;  %2804 = vst [vmem:[#allocation43_spill] sm:$0xff] %v2283_v23 }
  0xc5   :  { %v583_v37 = vpop.f32.mrf.mxu3  ;;  %801 = vmatmul.f32.gmra.mxu0 %v2252_v24  ;;  %878 = vmatmul.f32.gmra.mxu1 %v1474_v39  ;;  %v392_v39 = vld [vmem:[%s2715_s2 + $0x348] sm:$0xff]  ;;  %2806 = vst [vmem:[#allocation45_spill] sm:$0xff] %v2307_v19  ;;  %v2320_v50 = vmul.f32 %v1934_v48, %v139_v31 }
  0xc6   :  { %v2267_v56 = vadd.f32 %v583_v37, %v506_v62  ;;  %v138_v62 = vunpack.c.h.bf16 %v52_v27  ;;  %1074 = vmatpush.msra.mxu0 %v392_v39  ;;  %v424_v27 = vld [vmem:[%s2715_s2 + $0x448] sm:$0xff] }
  0xc7   :  { %1151 = vmatpush.msra.mxu1 %v424_v27  ;;  %v55_v39 = vld [vmem:[%s2713_s0 + $0x10c] sm:$0xff]  ;;  %2808 = vst [vmem:[#allocation47_spill] sm:$0xff] %v2320_v50  ;;  %v56_v27 = vld [vmem:[%s2713_s0 + $0x114] sm:$0xf] }
  0xc8   :  { %2801 = vst [vmem:[#allocation40_spill] sm:$0xff] %v2267_v56  ;;  %v2310_v12 = vmul.f32 %v1914_v35, %v138_v62  ;;  %v324_v62 = vld [vmem:[%s2715_s2 + $0x128] sm:$0xff] }
  0xc9   :  { %650 = vmatmul.f32.gmra.mxu2 %v2270_v40 }
  0xca   :  { %727 = vmatmul.f32.gmra.mxu3 %v2273_v43  ;;  %v2294_v37 = vpop.f32.mrf.mxu0  ;;  %v2296_v43 = vpop.f32.mrf.mxu1  ;;  %2807 = vst [vmem:[#allocation46_spill] sm:$0xff] %v2310_v12  ;;  %922 = vmatpush.msra.mxu2 %v324_v62  ;;  %v356_v62 = vld [vmem:[%s2715_s2 + $0x228] sm:$0xff] }
  0xcb   :  { %999 = vmatpush.msra.mxu3 %v356_v62 }
  0xcc   :  { %v509_v40 = vpop.f32.mrf.mxu2 }
  0xcd   :  { %v586_v24 = vpop.f32.mrf.mxu3  ;;  %804 = vmatmul.f32.gmra.mxu0 %v2283_v23  ;;  %881 = vmatmul.f32.gmra.mxu1 %v1518_v57  ;;  %v390_v57 = vld [vmem:[%s2715_s2 + $0x338] sm:$0xff] }
  0xce   :  { %v2304_v56 = vadd.f32 %v586_v24, %v509_v40  ;;  %v142_v40 = vunpack.c.l.bf16 %v55_v39  ;;  %v143_v24 = vunpack.c.h.bf16 %v55_v39  ;;  %1075 = vmatpush.msra.mxu0 %v390_v57  ;;  %v422_v57 = vld [vmem:[%s2715_s2 + $0x438] sm:$0xff] }
  0xcf   :  { %1152 = vmatpush.msra.mxu1 %v422_v57 }
  0xd0   :  { %2805 = vst [vmem:[#allocation44_spill] sm:$0xff] %v2304_v56  ;;  %v2341_v23 = vmul.f32 %v1914_v35, %v143_v24  ;;  %v144_v56 = vunpack.c.l.bf16 %v56_v27 }
  0xd1   :  { %653 = vmatmul.f32.gmra.mxu2 %v2307_v19  ;;  %v2338_v19 = vmul.f32 %v1903_v22, %v142_v40  ;;  %v58_v40 = vld [vmem:[%s2713_s0 + $0x120] sm:$0xff] }
  0xd2   :  { %730 = vmatmul.f32.gmra.mxu3 %v2310_v12  ;;  %v2328_v16 = vpop.f32.mrf.mxu0  ;;  %v2330_v28 = vpop.f32.mrf.mxu1  ;;  %2811 = vst [vmem:[#allocation50_spill] sm:$0xff] %v2341_v23  ;;  %v148_v24 = vunpack.c.h.bf16 %v58_v40  ;;  %v2357_v27 = vmul.f32 %v1934_v48, %v144_v56 }
  0xd3   :  { %2810 = vst [vmem:[#allocation49_spill] sm:$0xff] %v2338_v19 }
  0xd4   :  { %v512_v31 = vpop.f32.mrf.mxu2  ;;  %2812 = vst [vmem:[#allocation51_spill] sm:$0xff] %v2357_v27 }
  0xd5   :  { %v589_v39 = vpop.f32.mrf.mxu3  ;;  %807 = vmatmul.f32.gmra.mxu0 %v2320_v50  ;;  %884 = vmatmul.f32.gmra.mxu1 %v1576_v15  ;;  %v147_v15 = vunpack.c.l.bf16 %v58_v40  ;;  %v59_v50 = vld [vmem:[%s2713_s0 + $0x128] sm:$0xf]  ;;  %v2372_v40 = vmul.f32 %v1914_v35, %v148_v24  ;;  %v354_v24 = vld [vmem:[%s2715_s2 + $0x218] sm:$0xff] }
  0xd6   :  { %v2335_v12 = vadd.f32 %v589_v39, %v512_v31  ;;  %v149_v56 = vunpack.c.l.bf16 %v59_v50  ;;  %1000 = vmatpush.msra.mxu3 %v354_v24 }
  0xd7   :  { %2815 = vst [vmem:[#allocation54_spill] sm:$0xff] %v2372_v40 }
  0xd8   :  { %2809 = vst [vmem:[#allocation48_spill] sm:$0xff] %v2335_v12 }
  0xd9   :  { %656 = vmatmul.f32.gmra.mxu2 %v2338_v19  ;;  %v2369_v19 = vmul.f32 %v1903_v22, %v147_v15  ;;  %v61_v15 = vld [vmem:[%s2713_s0 + $0x134] sm:$0xff] }
  0xda   :  { %733 = vmatmul.f32.gmra.mxu3 %v2341_v23  ;;  %v2359_v31 = vpop.f32.mrf.mxu0  ;;  %v2361_v39 = vpop.f32.mrf.mxu1  ;;  %v322_v23 = vld [vmem:[%s2715_s2 + $0x118] sm:$0xff]  ;;  %v152_v50 = vunpack.c.l.bf16 %v61_v15 }
  0xdb   :  { %2814 = vst [vmem:[#allocation53_spill] sm:$0xff] %v2369_v19  ;;  %923 = vmatpush.msra.mxu2 %v322_v23 }
  0xdc   :  { %v515_v12 = vpop.f32.mrf.mxu2 }
  0xdd   :  { %v592_v62 = vpop.f32.mrf.mxu3  ;;  %810 = vmatmul.f32.gmra.mxu0 %v2357_v27  ;;  %887 = vmatmul.f32.gmra.mxu1 %v1634_v42  ;;  %v420_v42 = vld [vmem:[%s2715_s2 + $0x428] sm:$0xff]  ;;  %v2394_v27 = vmul.f32 %v1934_v48, %v149_v56 }
  0xde   :  { %v2366_v57 = vadd.f32 %v592_v62, %v515_v12  ;;  %v388_v12 = vld [vmem:[%s2715_s2 + $0x328] sm:$0xff]  ;;  %1153 = vmatpush.msra.mxu1 %v420_v42  ;;  %v153_v62 = vunpack.c.h.bf16 %v61_v15 }
  0xdf   :  { %1076 = vmatpush.msra.mxu0 %v388_v12  ;;  %2816 = vst [vmem:[#allocation55_spill] sm:$0xff] %v2394_v27 }
  0xe0   :  { %2813 = vst [vmem:[#allocation52_spill] sm:$0xff] %v2366_v57  ;;  %v62_v57 = vld [vmem:[%s2713_s0 + $0x13c] sm:$0xf]  ;;  %v2409_v15 = vmul.f32 %v1914_v35, %v153_v62 }
  0xe1   :  { %659 = vmatmul.f32.gmra.mxu2 %v2369_v19  ;;  %v2406_v19 = vmul.f32 %v1903_v22, %v152_v50  ;;  %v154_v56 = vunpack.c.l.bf16 %v62_v57  ;;  %v386_v50 = vld [vmem:[%s2715_s2 + $0x318] sm:$0xff] }
  0xe2   :  { %736 = vmatmul.f32.gmra.mxu3 %v2372_v40  ;;  %v2396_v23 = vpop.f32.mrf.mxu0  ;;  %v2398_v12 = vpop.f32.mrf.mxu1  ;;  %2819 = vst [vmem:[#allocation58_spill] sm:$0xff] %v2409_v15  ;;  %v64_v40 = vld [vmem:[%s2713_s0 + $0x148] sm:$0xff]  ;;  %1077 = vmatpush.msra.mxu0 %v386_v50  ;;  %v418_v50 = vld [vmem:[%s2715_s2 + $0x418] sm:$0xff] }
  0xe3   :  { %2818 = vst [vmem:[#allocation57_spill] sm:$0xff] %v2406_v19  ;;  %v158_v57 = vunpack.c.h.bf16 %v64_v40  ;;  %v2425_v62 = vmul.f32 %v1934_v48, %v154_v56  ;;  %1154 = vmatpush.msra.mxu1 %v418_v50 }
  0xe4   :  { %v518_v5 = vpop.f32.mrf.mxu2 }
  0xe5   :  { %v595_v24 = vpop.f32.mrf.mxu3  ;;  %813 = vmatmul.f32.gmra.mxu0 %v2394_v27  ;;  %890 = vmatmul.f32.gmra.mxu1 %v1692_v4  ;;  %v157_v4 = vunpack.c.l.bf16 %v64_v40  ;;  %2820 = vst [vmem:[#allocation59_spill] sm:$0xff] %v2425_v62  ;;  %v2446_v26 = vmul.f32 %v1914_v35, %v158_v57 }
  0xe6   :  { %v2403_v42 = vadd.f32 %v595_v24, %v518_v5  ;;  %v320_v5 = vld [vmem:[%s2715_s2 + $0x108] sm:$0xff] }
  0xe7   :  { %924 = vmatpush.msra.mxu2 %v320_v5  ;;  %v352_v5 = vld [vmem:[%s2715_s2 + $0x208] sm:$0xff]  ;;  %2823 = vst [vmem:[#allocation62_spill] sm:$0xff] %v2446_v26 }
  0xe8   :  { %2817 = vst [vmem:[#allocation56_spill] sm:$0xff] %v2403_v42  ;;  %v65_v42 = vld [vmem:[%s2713_s0 + $0x150] sm:$0xf]  ;;  %1001 = vmatpush.msra.mxu3 %v352_v5  ;;  %v163_v5 = vunpack.c.h.bf16 %v67_v36 }
  0xe9   :  { %662 = vmatmul.f32.gmra.mxu2 %v2406_v19  ;;  %v2443_v19 = vmul.f32 %v1903_v22, %v157_v4  ;;  %v159_v3 = vunpack.c.l.bf16 %v65_v42  ;;  %v542_v42 = vadd.f32 %v2123_v18, %v2121_v47  ;;  %v70_v47 = vld [vmem:[%s2713_s0 + $0x170] sm:$0xff] }
  0xea   :  { %739 = vmatmul.f32.gmra.mxu3 %v2409_v15  ;;  %v2427_v24 = vpop.f32.mrf.mxu0  ;;  %v2429_v27 = vpop.f32.mrf.mxu1 }
  0xeb   :  { %2822 = vst [vmem:[#allocation61_spill] sm:$0xff] %v2443_v19  ;;  %v2456_v4 = vmul.f32 %v1934_v48, %v159_v3 }
  0xec   :  { %v521_v40 = vpop.f32.mrf.mxu2 }
  0xed   :  { %v598_v15 = vpop.f32.mrf.mxu3  ;;  %816 = vmatmul.f32.gmra.mxu0 %v2425_v62  ;;  %893 = vmatmul.f32.gmra.mxu1 %v1744_v32  ;;  %v68_v32 = vld [vmem:[%s2713_s0 + $0x164] sm:$0xf]  ;;  %v2475_v62 = vmul.f32 %v1914_v35, %v163_v5 }
  0xee   :  { %v2440_v56 = vadd.f32 %v598_v15, %v521_v40  ;;  %v162_v15 = vunpack.c.l.bf16 %v67_v36  ;;  %v384_v40 = vld [vmem:[%s2715_s2 + $0x308] sm:$0xff]  ;;  %v164_v18 = vunpack.c.l.bf16 %v68_v32 }
  0xef   :  { %v416_v36 = vld [vmem:[%s2715_s2 + $0x408] sm:$0xff]  ;;  %1078 = vmatpush.msra.mxu0 %v384_v40 }
  0xf0   :  { %2821 = vst [vmem:[#allocation60_spill] sm:$0xff] %v2440_v56  ;;  %1155 = vmatpush.msra.mxu1 %v416_v36  ;;  %v2485_v5 = vmul.f32 %v1934_v48, %v164_v18 }
  0xf1   :  { %665 = vmatmul.f32.gmra.mxu2 %v2443_v19  ;;  %v2472_v19 = vmul.f32 %v1903_v22, %v162_v15  ;;  %v167_v15 = vunpack.c.l.bf16 %v70_v47 }
  0xf2   :  { %742 = vmatmul.f32.gmra.mxu3 %v2446_v26  ;;  %v772_v57 = vpop.f32.mrf.mxu0  ;;  %v2458_v50 = vpop.f32.mrf.mxu1 }
  0xf3   :  { %2824 = vst [vmem:[#allocation63_spill] sm:$0xff] %v2458_v50  ;;  %v2495_v32 = vmul.f32 %v1903_v22, %v167_v15 }
  0xf4   :  { %v618_v3 = vpop.f32.mrf.mxu2 }
  0xf5   :  { %v695_v26 = vpop.f32.mrf.mxu3  ;;  %v619_v50 = vadd.f32 %v618_v3, %v542_v42  ;;  %819 = vmatmul.f32.gmra.mxu0 %v2456_v4  ;;  %896 = vmatmul.f32.gmra.mxu1 %v1784_v55  ;;  %v168_v42 = vunpack.c.h.bf16 %v70_v47  ;;  %v71_v55 = vld [vmem:[%s2713_s0 + $0x178] sm:$0xf]  ;;  %v73_v47 = vld [vmem:[%s2713_s0 + $0x184] sm:$0xff] }
  0xf6   :  { %v169_v18 = vunpack.c.l.bf16 %v71_v55  ;;  %v173_v15 = vunpack.c.h.bf16 %v73_v47  ;;  %v548_v55 = vadd.f32 %v2188_v45, %v2186_v59 }
  0xf7   :  { %v696_v56 = vadd.f32 %v695_v26, %v619_v50  ;;  %v545_v26 = vadd.f32 %v2157_v11, %v2155_v9  ;;  %v2498_v3 = vmul.f32 %v1914_v35, %v168_v42  ;;  %v172_v11 = vunpack.c.l.bf16 %v73_v47 }
  0xf8   :  { %v2508_v42 = vmul.f32 %v1934_v48, %v169_v18  ;;  %v2521_v18 = vmul.f32 %v1914_v35, %v173_v15  ;;  %v551_v35 = vadd.f32 %v2225_v58, %v2223_v2  ;;  %v554_v58 = vadd.f32 %v2262_v34, %v2260_v61 }
  0xf9   :  { %v773_v6 = vadd.f32 %v772_v57, %v696_v56  ;;  %668 = vmatmul.f32.gmra.mxu2 %v2472_v19  ;;  %2825 = vst [vmem:[#allocation64_spill] sm:$0xff] %v2498_v3  ;;  %v557_v61 = vadd.f32 %v2296_v43, %v2294_v37  ;;  %v560_v43 = vadd.f32 %v2330_v28, %v2328_v16 }
  0xfa   :  { %745 = vmatmul.f32.gmra.mxu3 %v2475_v62  ;;  %v775_v40 = vpop.f32.mrf.mxu0  ;;  %v2487_v36 = vpop.f32.mrf.mxu1  ;;  %v563_v16 = vadd.f32 %v2361_v39, %v2359_v31  ;;  %v566_v31 = vadd.f32 %v2398_v12, %v2396_v23  ;;  %v569_v23 = vadd.f32 %v2429_v27, %v2427_v24  ;;  %v2831_v24 = vld [vmem:[#allocation24_spill] sm:$0xff] }
  0xfb   :  { %1217 = vst [vmem:[#allocation2] sm:$0xff] %v773_v6 }
  0xfc   :  { %v621_v56 = vpop.f32.mrf.mxu2 }
  0xfd   :  { %v698_v57 = vpop.f32.mrf.mxu3  ;;  %v622_v50 = vadd.f32 %v621_v56, %v545_v26  ;;  %822 = vmatmul.f32.gmra.mxu0 %v2485_v5  ;;  %899 = vmatmul.f32.gmra.mxu1 %v1824_v17  ;;  %v74_v17 = vld [vmem:[%s2713_s0 + $0x18c] sm:$0xf]  ;;  %s1337_s0 = smov [#allocation2]  }
  0xfe   :  { %v174_v47 = vunpack.c.l.bf16 %v74_v17  ;;  %s1262_s7 = sshll.u32 %s1337_s0, 4  ;;  %s1263_s7 = int_to_ptr.vmem [resolvable:$true] %s1262_s7 }
  0xff   :  { %v699_v9 = vadd.f32 %v698_v57, %v622_v50 }
 0x100   :  { %v2528_v59 = vmul.f32 %v1934_v48, %v174_v47 }
 0x101   :  { %v776_v6 = vadd.f32 %v775_v40, %v699_v9  ;;  %671 = vmatmul.f32.gmra.mxu2 %v2495_v32  ;;  %v2518_v9 = vmul.f32 %v1903_v22, %v172_v11 }
 0x102   :  { %748 = vmatmul.f32.gmra.mxu3 %v2498_v3  ;;  %v778_v26 = vpop.f32.mrf.mxu0  ;;  %v2510_v56 = vpop.f32.mrf.mxu1 }
 0x103   :  { %2826 = vst [vmem:[#allocation65_spill] sm:$0xff] %v2510_v56 }
 0x104   :  { %1220 = vst [vmem:[#allocation2 + $0x10] sm:$0xff] %v776_v6  ;;  %v624_v40 = vpop.f32.mrf.mxu2 }
 0x105   :  { %v701_v57 = vpop.f32.mrf.mxu3  ;;  %v625_v50 = vadd.f32 %v624_v40, %v548_v55  ;;  %825 = vmatmul.f32.gmra.mxu0 %v2508_v42  ;;  %902 = vmatmul.f32.gmra.mxu1 %v1858_v44 }
 0x107   :  { %v702_v3 = vadd.f32 %v701_v57, %v625_v50 }
 0x109   :  { %v779_v56 = vadd.f32 %v778_v26, %v702_v3  ;;  %674 = vmatmul.f32.gmra.mxu2 %v2518_v9 }
 0x10a   :  { %751 = vmatmul.f32.gmra.mxu3 %v2521_v18  ;;  %v781_v45 = vpop.f32.mrf.mxu0  ;;  %v2530_v22 = vpop.f32.mrf.mxu1 }
 0x10b   :  { %1222 = vst [vmem:[#allocation2 + $0x20] sm:$0xff] %v779_v56 }
 0x10c   :  { %v627_v6 = vpop.f32.mrf.mxu2 }
 0x10d   :  { %v704_v11 = vpop.f32.mrf.mxu3  ;;  %v628_v44 = vadd.f32 %v627_v6, %v551_v35  ;;  %828 = vmatmul.f32.gmra.mxu0 %v2528_v59  ;;  %905 = vmatmul.f32.gmra.mxu1 %v1892_v10 }
 0x10f   :  { %v705_v3 = vadd.f32 %v704_v11, %v628_v44 }
 0x111   :  { %v782_v15 = vadd.f32 %v781_v45, %v705_v3  ;;  %925 = vmatmul.f32.vlgmr.msra.gmra.mxu2 %v1500_v51 }
 0x112   :  { %1002 = vmatmul.f32.vlgmr.msra.gmra.mxu3 %v1926_v33  ;;  %v784_v48 = vpop.f32.mrf.mxu0  ;;  %v2538_v26 = vpop.f32.mrf.mxu1 }
 0x113   :  { %1224 = vst [vmem:[#allocation2 + $0x30] sm:$0xff] %v782_v15  ;;  %v2827_v15 = vld [vmem:[#allocation19_spill] sm:$0xff] }
 0x114   :  { %v630_v2 = vpop.f32.mrf.mxu2 }
 0x115   :  { %v707_v56 = vpop.f32.mrf.mxu3  ;;  %v631_v17 = vadd.f32 %v630_v2, %v554_v58  ;;  %1079 = vmatmul.f32.vlgmr.msra.gmra.mxu0 %v1931_v38  ;;  %1156 = vmatmul.f32.vlgmr.msra.gmra.mxu1 %v1942_v54  ;;  %v2829_v58 = vld [vmem:[#allocation12_spill] sm:$0xff] }
 0x117   :  { %v708_v10 = vadd.f32 %v707_v56, %v631_v17 }
 0x119   :  { %v785_v55 = vadd.f32 %v784_v48, %v708_v10  ;;  %928 = vmatmul.f32.gmra.mxu2 %v1552_v7  ;;  %v2832_v10 = vld [vmem:[#allocation22_spill] sm:$0xff] }
 0x11a   :  { %1005 = vmatmul.f32.gmra.mxu3 %v1954_v1  ;;  %v787_v51 = vpop.f32.mrf.mxu0  ;;  %v2546_v33 = vpop.f32.mrf.mxu1 }
 0x11b   :  { %1226 = vst [vmem:[#allocation2 + $0x40] sm:$0xff] %v785_v55  ;;  %v2833_v55 = vld [vmem:[#allocation23_spill] sm:$0xff] }
 0x11c   :  { %v633_v34 = vpop.f32.mrf.mxu2 }
 0x11d   :  { %v710_v40 = vpop.f32.mrf.mxu3  ;;  %v634_v57 = vadd.f32 %v633_v34, %v557_v61  ;;  %1082 = vmatmul.f32.gmra.mxu0 %v1957_v8  ;;  %1159 = vmatmul.f32.gmra.mxu1 %v1967_v21  ;;  %v2834_v34 = vld [vmem:[#allocation14_spill] sm:$0xff] }
 0x11f   :  { %v711_v38 = vadd.f32 %v710_v40, %v634_v57  ;;  %v2835_v40 = vld [vmem:[#allocation25_spill] sm:$0xff] }
 0x121   :  { %v788_v54 = vadd.f32 %v787_v51, %v711_v38  ;;  %931 = vmatmul.f32.gmra.mxu2 %v1610_v30 }
 0x122   :  { %1008 = vmatmul.f32.gmra.mxu3 %v1985_v41  ;;  %v790_v7 = vpop.f32.mrf.mxu0  ;;  %v2554_v1 = vpop.f32.mrf.mxu1 }
 0x123   :  { %1228 = vst [vmem:[#allocation2 + $0x50] sm:$0xff] %v788_v54 }
 0x124   :  { %v636_v37 = vpop.f32.mrf.mxu2 }
 0x125   :  { %v713_v50 = vpop.f32.mrf.mxu3  ;;  %v637_v47 = vadd.f32 %v636_v37, %v560_v43  ;;  %1085 = vmatmul.f32.gmra.mxu0 %v1988_v49  ;;  %1162 = vmatmul.f32.gmra.mxu1 %v1998_v0  ;;  %v2836_v43 = vld [vmem:[#allocation28_spill] sm:$0xff] }
 0x127   :  { %v714_v8 = vadd.f32 %v713_v50, %v637_v47  ;;  %v2837_v50 = vld [vmem:[#allocation26_spill] sm:$0xff]  ;;  %v2838_v47 = vld [vmem:[#allocation27_spill] sm:$0xff] }
 0x129   :  { %v791_v21 = vadd.f32 %v790_v7, %v714_v8  ;;  %934 = vmatmul.f32.gmra.mxu2 %v1668_v60 }
 0x12a   :  { %1011 = vmatmul.f32.gmra.mxu3 %v2010_v13  ;;  %v793_v30 = vpop.f32.mrf.mxu0  ;;  %v2562_v41 = vpop.f32.mrf.mxu1 }
 0x12b   :  { %1230 = vst [vmem:[#allocation2 + $0x60] sm:$0xff] %v791_v21 }
 0x12c   :  { %v639_v28 = vpop.f32.mrf.mxu2 }
 0x12d   :  { %v716_v45 = vpop.f32.mrf.mxu3  ;;  %v640_v35 = vadd.f32 %v639_v28, %v563_v16  ;;  %1088 = vmatmul.f32.gmra.mxu0 %v2013_v14  ;;  %1165 = vmatmul.f32.gmra.mxu1 %v2029_v52  ;;  %v2840_v16 = vld [vmem:[#allocation29_spill] sm:$0xff] }
 0x12f   :  { %v717_v49 = vadd.f32 %v716_v45, %v640_v35 }
 0x131   :  { %v794_v0 = vadd.f32 %v793_v30, %v717_v49  ;;  %937 = vmatmul.f32.gmra.mxu2 %v1720_v20  ;;  %v2839_v30 = vld [vmem:[#allocation16_spill] sm:$0xff] }
 0x132   :  { %1014 = vmatmul.f32.gmra.mxu3 %v2035_v63  ;;  %v796_v60 = vpop.f32.mrf.mxu0  ;;  %v2570_v13 = vpop.f32.mrf.mxu1 }
 0x133   :  { %1232 = vst [vmem:[#allocation2 + $0x70] sm:$0xff] %v794_v0  ;;  %v2841_v0 = vld [vmem:[#allocation32_spill] sm:$0xff] }
 0x134   :  { %v642_v39 = vpop.f32.mrf.mxu2 }
 0x135   :  { %v719_v6 = vpop.f32.mrf.mxu3  ;;  %v643_v11 = vadd.f32 %v642_v39, %v566_v31  ;;  %1091 = vmatmul.f32.gmra.mxu0 %v2038_v25  ;;  %1168 = vmatmul.f32.gmra.mxu1 %v2060_v29  ;;  %v2828_v25 = vld [vmem:[#allocation20_spill] sm:$0xff]  ;;  %v2842_v31 = vld [vmem:[#allocation30_spill] sm:$0xff]  ;;  %v2843_v39 = vld [vmem:[#allocation31_spill] sm:$0xff] }
 0x137   :  { %v720_v14 = vadd.f32 %v719_v6, %v643_v11 }
 0x139   :  { %v797_v52 = vadd.f32 %v796_v60, %v720_v14  ;;  %940 = vmatmul.f32.gmra.mxu2 %v1763_v46  ;;  %v2830_v46 = vld [vmem:[#allocation21_spill] sm:$0xff]  ;;  %v2844_v14 = vld [vmem:[#allocation18_spill] sm:$0xff] }
 0x13a   :  { %1017 = vmatmul.f32.gmra.mxu3 %v2066_v53  ;;  %v799_v20 = vpop.f32.mrf.mxu0  ;;  %v2578_v63 = vpop.f32.mrf.mxu1 }
 0x13b   :  { %1234 = vst [vmem:[#allocation2 + $0x80] sm:$0xff] %v797_v52  ;;  %v2845_v52 = vld [vmem:[#allocation33_spill] sm:$0xff] }
 0x13c   :  { %v645_v12 = vpop.f32.mrf.mxu2 }
 0x13d   :  { %v722_v44 = vpop.f32.mrf.mxu3  ;;  %v646_v3 = vadd.f32 %v645_v12, %v569_v23  ;;  %1094 = vmatmul.f32.gmra.mxu0 %v2827_v15  ;;  %1171 = vmatmul.f32.gmra.mxu1 %v2828_v25  ;;  %v2847_v25 = vld [vmem:[#allocation34_spill] sm:$0xff] }
 0x13f   :  { %v723_v29 = vadd.f32 %v722_v44, %v646_v3  ;;  %v2846_v3 = vld [vmem:[#allocation36_spill] sm:$0xff] }
 0x141   :  { %v800_v48 = vadd.f32 %v799_v20, %v723_v29  ;;  %943 = vmatmul.f32.gmra.mxu2 %v2829_v58  ;;  %v2848_v29 = vld [vmem:[#allocation35_spill] sm:$0xff] }
 0x142   :  { %1020 = vmatmul.f32.gmra.mxu3 %v2830_v46  ;;  %v802_v53 = vpop.f32.mrf.mxu0  ;;  %v2586_v2 = vpop.f32.mrf.mxu1  ;;  %v2849_v46 = vld [vmem:[#allocation5_spill] sm:$0xff] }
 0x143   :  { %1236 = vst [vmem:[#allocation2 + $0x90] sm:$0xff] %v800_v48 }
 0x144   :  { %v648_v56 = vpop.f32.mrf.mxu2 }
 0x145   :  { %v725_v27 = vpop.f32.mrf.mxu3  ;;  %v649_v17 = vadd.f32 %v648_v56, %v2831_v24  ;;  %1097 = vmatmul.f32.gmra.mxu0 %v2832_v10  ;;  %1174 = vmatmul.f32.gmra.mxu1 %v2833_v55  ;;  %v2851_v10 = vld [vmem:[#allocation40_spill] sm:$0xff] }
 0x147   :  { %v726_v51 = vadd.f32 %v725_v27, %v649_v17 }
 0x149   :  { %v803_v61 = vadd.f32 %v802_v53, %v726_v51  ;;  %946 = vmatmul.f32.gmra.mxu2 %v2834_v34  ;;  %v2850_v53 = vld [vmem:[#allocation37_spill] sm:$0xff]  ;;  %v2852_v51 = vld [vmem:[#allocation38_spill] sm:$0xff] }
 0x14a   :  { %1023 = vmatmul.f32.gmra.mxu3 %v2835_v40  ;;  %v805_v57 = vpop.f32.mrf.mxu0  ;;  %v2593_v38 = vpop.f32.mrf.mxu1 }
 0x14b   :  { %1238 = vst [vmem:[#allocation2 + $0xa0] sm:$0xff] %v803_v61  ;;  %v2853_v61 = vld [vmem:[#allocation39_spill] sm:$0xff] }
 0x14c   :  { %v651_v54 = vpop.f32.mrf.mxu2 }
 0x14d   :  { %v728_v7 = vpop.f32.mrf.mxu3  ;;  %v652_v37 = vadd.f32 %v651_v54, %v2836_v43  ;;  %1100 = vmatmul.f32.gmra.mxu0 %v2837_v50  ;;  %1177 = vmatmul.f32.gmra.mxu1 %v2838_v47  ;;  %v2855_v54 = vld [vmem:[#allocation41_spill] sm:$0xff]  ;;  %v2856_v47 = vld [vmem:[#allocation44_spill] sm:$0xff] }
 0x14f   :  { %v729_v8 = vadd.f32 %v728_v7, %v652_v37 }
 0x151   :  { %v806_v21 = vadd.f32 %v805_v57, %v729_v8  ;;  %949 = vmatmul.f32.gmra.mxu2 %v2839_v30  ;;  %v2854_v57 = vld [vmem:[#allocation6_spill] sm:$0xff]  ;;  %v2858_v30 = vld [vmem:[#allocation43_spill] sm:$0xff] }
 0x152   :  { %1026 = vmatmul.f32.gmra.mxu3 %v2840_v16  ;;  %v808_v28 = vpop.f32.mrf.mxu0  ;;  %v2600_v45 = vpop.f32.mrf.mxu1 }
 0x153   :  { %1240 = vst [vmem:[#allocation2 + $0xb0] sm:$0xff] %v806_v21  ;;  %v2857_v21 = vld [vmem:[#allocation42_spill] sm:$0xff] }
 0x154   :  { %v654_v35 = vpop.f32.mrf.mxu2 }
 0x155   :  { %v731_v49 = vpop.f32.mrf.mxu3  ;;  %v655_v60 = vadd.f32 %v654_v35, %v2841_v0  ;;  %1103 = vmatmul.f32.gmra.mxu0 %v2842_v31  ;;  %1180 = vmatmul.f32.gmra.mxu1 %v2843_v39  ;;  %v2859_v35 = vld [vmem:[#allocation7_spill] sm:$0xff] }
 0x157   :  { %v732_v6 = vadd.f32 %v731_v49, %v655_v60  ;;  %v2860_v49 = vld [vmem:[#allocation45_spill] sm:$0xff] }
 0x159   :  { %v809_v11 = vadd.f32 %v808_v28, %v732_v6  ;;  %952 = vmatmul.f32.gmra.mxu2 %v2844_v14  ;;  %v2861_v6 = vld [vmem:[#allocation48_spill] sm:$0xff]  ;;  %v2862_v14 = vld [vmem:[#allocation46_spill] sm:$0xff] }
 0x15a   :  { %1029 = vmatmul.f32.gmra.mxu3 %v2845_v52  ;;  %v811_v20 = vpop.f32.mrf.mxu0  ;;  %v2607_v23 = vpop.f32.mrf.mxu1  ;;  %v2863_v52 = vld [vmem:[#allocation47_spill] sm:$0xff] }
 0x15b   :  { %1242 = vst [vmem:[#allocation2 + $0xc0] sm:$0xff] %v809_v11 }
 0x15c   :  { %v657_v12 = vpop.f32.mrf.mxu2 }
 0x15d   :  { %v734_v44 = vpop.f32.mrf.mxu3  ;;  %v658_v15 = vadd.f32 %v657_v12, %v2846_v3  ;;  %1106 = vmatmul.f32.gmra.mxu0 %v2847_v25  ;;  %1183 = vmatmul.f32.gmra.mxu1 %v2848_v29  ;;  %v2865_v3 = vld [vmem:[#allocation49_spill] sm:$0xff] }
 0x15f   :  { %v735_v48 = vadd.f32 %v734_v44, %v658_v15  ;;  %v2864_v44 = vld [vmem:[#allocation8_spill] sm:$0xff] }
 0x161   :  { %v812_v58 = vadd.f32 %v811_v20, %v735_v48  ;;  %955 = vmatmul.f32.gmra.mxu2 %v2849_v46 }
 0x162   :  { %1032 = vmatmul.f32.gmra.mxu3 %v2850_v53  ;;  %v814_v56 = vpop.f32.mrf.mxu0  ;;  %v2614_v27 = vpop.f32.mrf.mxu1  ;;  %v2867_v53 = vld [vmem:[#allocation50_spill] sm:$0xff] }
 0x163   :  { %1244 = vst [vmem:[#allocation2 + $0xd0] sm:$0xff] %v812_v58  ;;  %v2866_v58 = vld [vmem:[#allocation52_spill] sm:$0xff] }
 0x164   :  { %v660_v24 = vpop.f32.mrf.mxu2 }
 0x165   :  { %v737_v17 = vpop.f32.mrf.mxu3  ;;  %v661_v55 = vadd.f32 %v660_v24, %v2851_v10  ;;  %1109 = vmatmul.f32.gmra.mxu0 %v2852_v51  ;;  %1186 = vmatmul.f32.gmra.mxu1 %v2853_v61  ;;  %v2869_v10 = vld [vmem:[#allocation9_spill] sm:$0xff] }
 0x167   :  { %v738_v34 = vadd.f32 %v737_v17, %v661_v55  ;;  %v2870_v55 = vld [vmem:[#allocation53_spill] sm:$0xff] }
 0x169   :  { %v815_v40 = vadd.f32 %v814_v56, %v738_v34  ;;  %958 = vmatmul.f32.gmra.mxu2 %v2854_v57  ;;  %v2868_v56 = vld [vmem:[#allocation51_spill] sm:$0xff]  ;;  %v2871_v57 = vld [vmem:[#allocation56_spill] sm:$0xff] }
 0x16a   :  { %1035 = vmatmul.f32.gmra.mxu3 %v2855_v54  ;;  %v817_v7 = vpop.f32.mrf.mxu0  ;;  %v2621_v43 = vpop.f32.mrf.mxu1 }
 0x16b   :  { %1246 = vst [vmem:[#allocation2 + $0xe0] sm:$0xff] %v815_v40 }
 0x16c   :  { %v663_v37 = vpop.f32.mrf.mxu2 }
 0x16d   :  { %v740_v50 = vpop.f32.mrf.mxu3  ;;  %v664_v8 = vadd.f32 %v663_v37, %v2856_v47  ;;  %1112 = vmatmul.f32.gmra.mxu0 %v2857_v21  ;;  %1189 = vmatmul.f32.gmra.mxu1 %v2858_v30  ;;  %v2873_v37 = vld [vmem:[#allocation55_spill] sm:$0xff]  ;;  %v2875_v21 = vld [vmem:[#allocation57_spill] sm:$0xff] }
 0x16f   :  { %v741_v16 = vadd.f32 %v740_v50, %v664_v8  ;;  %v2874_v8 = vld [vmem:[#allocation10_spill] sm:$0xff] }
 0x171   :  { %v818_v28 = vadd.f32 %v817_v7, %v741_v16  ;;  %961 = vmatmul.f32.gmra.mxu2 %v2859_v35  ;;  %v2872_v7 = vld [vmem:[#allocation54_spill] sm:$0xff] }
 0x172   :  { %1038 = vmatmul.f32.gmra.mxu3 %v2860_v49  ;;  %v820_v0 = vpop.f32.mrf.mxu0  ;;  %v2628_v60 = vpop.f32.mrf.mxu1  ;;  %v2876_v49 = vld [vmem:[#allocation60_spill] sm:$0xff] }
 0x173   :  { %1248 = vst [vmem:[#allocation2 + $0xf0] sm:$0xff] %v818_v28 }
 0x174   :  { %v666_v31 = vpop.f32.mrf.mxu2 }
 0x175   :  { %v743_v39 = vpop.f32.mrf.mxu3  ;;  %v667_v11 = vadd.f32 %v666_v31, %v2861_v6  ;;  %1115 = vmatmul.f32.gmra.mxu0 %v2862_v14  ;;  %1192 = vmatmul.f32.gmra.mxu1 %v2863_v52  ;;  %v2877_v31 = vld [vmem:[#allocation58_spill] sm:$0xff]  ;;  %v2879_v14 = vld [vmem:[#allocation11_spill] sm:$0xff]  ;;  %v2880_v52 = vld [vmem:[#allocation61_spill] sm:$0xff] }
 0x177   :  { %v744_v20 = vadd.f32 %v743_v39, %v667_v11  ;;  %v2878_v39 = vld [vmem:[#allocation59_spill] sm:$0xff] }
 0x179   :  { %v821_v12 = vadd.f32 %v820_v0, %v744_v20  ;;  %964 = vmatmul.f32.gmra.mxu2 %v2864_v44 }
 0x17a   :  { %1041 = vmatmul.f32.gmra.mxu3 %v2865_v3  ;;  %v823_v15 = vpop.f32.mrf.mxu0  ;;  %v2635_v25 = vpop.f32.mrf.mxu1 }
 0x17b   :  { %1250 = vst [vmem:[#allocation2 + $0x100] sm:$0xff] %v821_v12 }
 0x17c   :  { %v669_v29 = vpop.f32.mrf.mxu2 }
 0x17d   :  { %v746_v48 = vpop.f32.mrf.mxu3  ;;  %v670_v46 = vadd.f32 %v669_v29, %v2866_v58  ;;  %1118 = vmatmul.f32.gmra.mxu0 %v2867_v53  ;;  %1195 = vmatmul.f32.gmra.mxu1 %v2868_v56  ;;  %v2883_v53 = vld [vmem:[#allocation13_spill] sm:$0xff] }
 0x17f   :  { %v747_v24 = vadd.f32 %v746_v48, %v670_v46  ;;  %v2882_v48 = vld [vmem:[#allocation62_spill] sm:$0xff] }
 0x181   :  { %v824_v17 = vadd.f32 %v823_v15, %v747_v24  ;;  %967 = vmatmul.f32.gmra.mxu2 %v2869_v10  ;;  %v2881_v15 = vld [vmem:[#allocation63_spill] sm:$0xff] }
 0x182   :  { %1044 = vmatmul.f32.gmra.mxu3 %v2870_v55  ;;  %v826_v51 = vpop.f32.mrf.mxu0  ;;  %v2642_v61 = vpop.f32.mrf.mxu1 }
 0x183   :  { %1252 = vst [vmem:[#allocation2 + $0x110] sm:$0xff] %v824_v17 }
 0x184   :  { %v672_v34 = vpop.f32.mrf.mxu2 }
 0x185   :  { %v749_v40 = vpop.f32.mrf.mxu3  ;;  %v673_v54 = vadd.f32 %v672_v34, %v2871_v57  ;;  %1121 = vmatmul.f32.gmra.mxu0 %v2872_v7  ;;  %1198 = vmatmul.f32.gmra.mxu1 %v2873_v37 }
 0x187   :  { %v750_v50 = vadd.f32 %v749_v40, %v673_v54  ;;  %v2884_v40 = vld [vmem:[#allocation15_spill] sm:$0xff] }
 0x189   :  { %v827_v47 = vadd.f32 %v826_v51, %v750_v50  ;;  %970 = vmatmul.f32.gmra.mxu2 %v2874_v8  ;;  %v2885_v50 = vld [vmem:[#allocation65_spill] sm:$0xff] }
 0x18a   :  { %1047 = vmatmul.f32.gmra.mxu3 %v2875_v21  ;;  %v829_v30 = vpop.f32.mrf.mxu0  ;;  %v2649_v16 = vpop.f32.mrf.mxu1  ;;  %v2887_v8 = vld [vmem:[#allocation17_spill] sm:$0xff] }
 0x18b   :  { %1254 = vst [vmem:[#allocation2 + $0x120] sm:$0xff] %v827_v47 }
 0x18c   :  { %v675_v28 = vpop.f32.mrf.mxu2 }
 0x18d   :  { %v752_v35 = vpop.f32.mrf.mxu3  ;;  %v676_v0 = vadd.f32 %v675_v28, %v2876_v49  ;;  %1124 = vmatmul.f32.gmra.mxu0 %v2877_v31  ;;  %1201 = vmatmul.f32.gmra.mxu1 %v2878_v39 }
 0x18f   :  { %v753_v6 = vadd.f32 %v752_v35, %v676_v0 }
 0x191   :  { %v830_v11 = vadd.f32 %v829_v30, %v753_v6  ;;  %973 = vmatmul.f32.gmra.mxu2 %v2879_v14 }
 0x192   :  { %1050 = vmatmul.f32.gmra.mxu3 %v2880_v52  ;;  %v1080_v20 = vpop.f32.mrf.mxu0  ;;  %v1157_v12 = vpop.f32.mrf.mxu1 }
 0x193   :  { %1256 = vst [vmem:[#allocation2 + $0x130] sm:$0xff] %v830_v11 }
 0x194   :  { %v926_v44 = vpop.f32.mrf.mxu2 }
 0x195   :  { %v1003_v3 = vpop.f32.mrf.mxu3  ;;  %v927_v29 = vadd.f32 %v926_v44, %v2881_v15  ;;  %1127 = vmatmul.f32.gmra.mxu0 %v2882_v48  ;;  %1204 = vmatmul.f32.gmra.mxu1 %v2456_v4 }
 0x197   :  { %v1004_v58 = vadd.f32 %v1003_v3, %v927_v29 }
 0x199   :  { %v1081_v46 = vadd.f32 %v1080_v20, %v1004_v58  ;;  %976 = vmatmul.f32.gmra.mxu2 %v2883_v53 }
 0x19a   :  { %1053 = vmatmul.f32.gmra.mxu3 %v2472_v19  ;;  %v1083_v56 = vpop.f32.mrf.mxu0  ;;  %v1160_v24 = vpop.f32.mrf.mxu1 }
 0x19b   :  { %v1158_v17 = vadd.f32 %v1157_v12, %v1081_v46 }
 0x19c   :  { %v929_v10 = vpop.f32.mrf.mxu2 }
 0x19d   :  { %v1006_v55 = vpop.f32.mrf.mxu3  ;;  %1219 = vst.msk [vmem:[#allocation2 + $0x8] sm:$0xff] %vm1218_vm0, %v1158_v17  ;;  %v930_v51 = vadd.f32 %v929_v10, %v2487_v36  ;;  %1130 = vmatmul.f32.gmra.mxu0 %v2475_v62  ;;  %1207 = vmatmul.f32.gmra.mxu1 %v2485_v5  ;;  %v2886_v36 = vld [vmem:[#allocation64_spill] sm:$0xff] }
 0x19f   :  { %v1007_v4 = vadd.f32 %v1006_v55, %v930_v51 }
 0x1a1   :  { %v1084_v34 = vadd.f32 %v1083_v56, %v1007_v4  ;;  %979 = vmatmul.f32.gmra.mxu2 %v2884_v40 }
 0x1a2   :  { %1056 = vmatmul.f32.gmra.mxu3 %v2495_v32  ;;  %v1086_v19 = vpop.f32.mrf.mxu0  ;;  %v1163_v57 = vpop.f32.mrf.mxu1 }
 0x1a3   :  { %v1161_v54 = vadd.f32 %v1160_v24, %v1084_v34 }
 0x1a4   :  { %v932_v7 = vpop.f32.mrf.mxu2 }
 0x1a5   :  { %v1009_v37 = vpop.f32.mrf.mxu3  ;;  %1221 = vst.msk [vmem:[#allocation2 + $0x18] sm:$0xff] %vm1218_vm0, %v1161_v54  ;;  %v933_v47 = vadd.f32 %v932_v7, %v2885_v50  ;;  %1133 = vmatmul.f32.gmra.mxu0 %v2886_v36  ;;  %1210 = vmatmul.f32.gmra.mxu1 %v2508_v42 }
 0x1a7   :  { %v1010_v62 = vadd.f32 %v1009_v37, %v933_v47 }
 0x1a9   :  { %v1087_v5 = vadd.f32 %v1086_v19, %v1010_v62  ;;  %982 = vmatmul.f32.gmra.mxu2 %v2887_v8 }
 0x1aa   :  { %1059 = vmatmul.f32.gmra.mxu3 %v2518_v9  ;;  %v1089_v32 = vpop.f32.mrf.mxu0  ;;  %v1166_v21 = vpop.f32.mrf.mxu1 }
 0x1ab   :  { %v1164_v30 = vadd.f32 %v1163_v57, %v1087_v5 }
 0x1ac   :  { %v935_v28 = vpop.f32.mrf.mxu2 }
 0x1ad   :  { %v1012_v35 = vpop.f32.mrf.mxu3  ;;  %1223 = vst.msk [vmem:[#allocation2 + $0x28] sm:$0xff] %vm1218_vm0, %v1164_v30  ;;  %v936_v49 = vadd.f32 %v935_v28, %v2530_v22  ;;  %1136 = vmatmul.f32.gmra.mxu0 %v2521_v18  ;;  %1213 = vmatmul.f32.gmra.mxu1 %v2528_v59 }
 0x1af   :  { %v1013_v42 = vadd.f32 %v1012_v35, %v936_v49 }
 0x1b1   :  { %v1090_v0 = vadd.f32 %v1089_v32, %v1013_v42 }
 0x1b2   :  { %v1092_v31 = vpop.f32.mrf.mxu0  ;;  %v1169_v39 = vpop.f32.mrf.mxu1 }
 0x1b3   :  { %v1167_v6 = vadd.f32 %v1166_v21, %v1090_v0 }
 0x1b4   :  { %v938_v11 = vpop.f32.mrf.mxu2 }
 0x1b5   :  { %v1015_v9 = vpop.f32.mrf.mxu3  ;;  %1225 = vst.msk [vmem:[#allocation2 + $0x38] sm:$0xff] %vm1218_vm0, %v1167_v6  ;;  %v939_v14 = vadd.f32 %v938_v11, %v2538_v26 }
 0x1b7   :  { %v1016_v52 = vadd.f32 %v1015_v9, %v939_v14 }
 0x1b9   :  { %v1093_v20 = vadd.f32 %v1092_v31, %v1016_v52 }
 0x1ba   :  { %v1095_v12 = vpop.f32.mrf.mxu0  ;;  %v1172_v44 = vpop.f32.mrf.mxu1 }
 0x1bb   :  { %v1170_v22 = vadd.f32 %v1169_v39, %v1093_v20 }
 0x1bc   :  { %v941_v3 = vpop.f32.mrf.mxu2 }
 0x1bd   :  { %v1018_v18 = vpop.f32.mrf.mxu3  ;;  %1227 = vst.msk [vmem:[#allocation2 + $0x48] sm:$0xff] %vm1218_vm0, %v1170_v22  ;;  %v942_v59 = vadd.f32 %v941_v3, %v2546_v33 }
 0x1bf   :  { %v1019_v15 = vadd.f32 %v1018_v18, %v942_v59 }
 0x1c1   :  { %v1096_v29 = vadd.f32 %v1095_v12, %v1019_v15 }
 0x1c2   :  { %v1098_v48 = vpop.f32.mrf.mxu0  ;;  %v1175_v58 = vpop.f32.mrf.mxu1 }
 0x1c3   :  { %v1173_v46 = vadd.f32 %v1172_v44, %v1096_v29 }
 0x1c4   :  { %v944_v53 = vpop.f32.mrf.mxu2 }
 0x1c5   :  { %v1021_v56 = vpop.f32.mrf.mxu3  ;;  %1229 = vst.msk [vmem:[#allocation2 + $0x58] sm:$0xff] %vm1218_vm0, %v1173_v46  ;;  %v945_v26 = vadd.f32 %v944_v53, %v2554_v1 }
 0x1c7   :  { %v1022_v24 = vadd.f32 %v1021_v56, %v945_v26 }
 0x1c9   :  { %v1099_v17 = vadd.f32 %v1098_v48, %v1022_v24 }
 0x1ca   :  { %v1101_v10 = vpop.f32.mrf.mxu0  ;;  %v1178_v55 = vpop.f32.mrf.mxu1 }
 0x1cb   :  { %v1176_v51 = vadd.f32 %v1175_v58, %v1099_v17 }
 0x1cc   :  { %v947_v4 = vpop.f32.mrf.mxu2 }
 0x1cd   :  { %v1024_v34 = vpop.f32.mrf.mxu3  ;;  %1231 = vst.msk [vmem:[#allocation2 + $0x68] sm:$0xff] %vm1218_vm0, %v1176_v51  ;;  %v948_v33 = vadd.f32 %v947_v4, %v2562_v41 }
 0x1cf   :  { %v1025_v40 = vadd.f32 %v1024_v34, %v948_v33 }
 0x1d1   :  { %v1102_v19 = vadd.f32 %v1101_v10, %v1025_v40 }
 0x1d2   :  { %v1104_v57 = vpop.f32.mrf.mxu0  ;;  %v1181_v54 = vpop.f32.mrf.mxu1 }
 0x1d3   :  { %v1179_v7 = vadd.f32 %v1178_v55, %v1102_v19 }
 0x1d4   :  { %v950_v37 = vpop.f32.mrf.mxu2 }
 0x1d5   :  { %v1027_v50 = vpop.f32.mrf.mxu3  ;;  %1233 = vst.msk [vmem:[#allocation2 + $0x78] sm:$0xff] %vm1218_vm0, %v1179_v7  ;;  %v951_v1 = vadd.f32 %v950_v37, %v2570_v13 }
 0x1d7   :  { %v1028_v47 = vadd.f32 %v1027_v50, %v951_v1 }
 0x1d9   :  { %v1105_v36 = vadd.f32 %v1104_v57, %v1028_v47 }
 0x1da   :  { %v1107_v62 = vpop.f32.mrf.mxu0  ;;  %v1184_v5 = vpop.f32.mrf.mxu1 }
 0x1db   :  { %v1182_v8 = vadd.f32 %v1181_v54, %v1105_v36 }
 0x1dc   :  { %v953_v32 = vpop.f32.mrf.mxu2 }
 0x1dd   :  { %v1030_v21 = vpop.f32.mrf.mxu3  ;;  %1235 = vst.msk [vmem:[#allocation2 + $0x88] sm:$0xff] %vm1218_vm0, %v1182_v8  ;;  %v954_v41 = vadd.f32 %v953_v32, %v2578_v63 }
 0x1df   :  { %v1031_v30 = vadd.f32 %v1030_v21, %v954_v41 }
 0x1e1   :  { %v1108_v28 = vadd.f32 %v1107_v62, %v1031_v30 }
 0x1e2   :  { %v1110_v35 = vpop.f32.mrf.mxu0  ;;  %v1187_v49 = vpop.f32.mrf.mxu1 }
 0x1e3   :  { %v1185_v42 = vadd.f32 %v1184_v5, %v1108_v28 }
 0x1e4   :  { %v956_v0 = vpop.f32.mrf.mxu2 }
 0x1e5   :  { %v1033_v31 = vpop.f32.mrf.mxu3  ;;  %1237 = vst.msk [vmem:[#allocation2 + $0x98] sm:$0xff] %vm1218_vm0, %v1185_v42  ;;  %v957_v13 = vadd.f32 %v956_v0, %v2586_v2 }
 0x1e7   :  { %v1034_v39 = vadd.f32 %v1033_v31, %v957_v13 }
 0x1e9   :  { %v1111_v6 = vadd.f32 %v1110_v35, %v1034_v39 }
 0x1ea   :  { %v1113_v11 = vpop.f32.mrf.mxu0  ;;  %v1190_v9 = vpop.f32.mrf.mxu1 }
 0x1eb   :  { %v1188_v14 = vadd.f32 %v1187_v49, %v1111_v6 }
 0x1ec   :  { %v959_v52 = vpop.f32.mrf.mxu2 }
 0x1ed   :  { %v1036_v20 = vpop.f32.mrf.mxu3  ;;  %1239 = vst.msk [vmem:[#allocation2 + $0xa8] sm:$0xff] %vm1218_vm0, %v1188_v14  ;;  %v960_v63 = vadd.f32 %v959_v52, %v2593_v38 }
 0x1ef   :  { %v1037_v12 = vadd.f32 %v1036_v20, %v960_v63 }
 0x1f1   :  { %v1114_v44 = vadd.f32 %v1113_v11, %v1037_v12 }
 0x1f2   :  { %v1116_v22 = vpop.f32.mrf.mxu0  ;;  %v1193_v3 = vpop.f32.mrf.mxu1 }
 0x1f3   :  { %v1191_v18 = vadd.f32 %v1190_v9, %v1114_v44 }
 0x1f4   :  { %v962_v59 = vpop.f32.mrf.mxu2 }
 0x1f5   :  { %v1039_v15 = vpop.f32.mrf.mxu3  ;;  %1241 = vst.msk [vmem:[#allocation2 + $0xb8] sm:$0xff] %vm1218_vm0, %v1191_v18  ;;  %v963_v2 = vadd.f32 %v962_v59, %v2600_v45 }
 0x1f7   :  { %v1040_v29 = vadd.f32 %v1039_v15, %v963_v2 }
 0x1f9   :  { %v1117_v48 = vadd.f32 %v1116_v22, %v1040_v29 }
 0x1fa   :  { %v1119_v58 = vpop.f32.mrf.mxu0  ;;  %v1196_v46 = vpop.f32.mrf.mxu1 }
 0x1fb   :  { %v1194_v53 = vadd.f32 %v1193_v3, %v1117_v48 }
 0x1fc   :  { %v965_v56 = vpop.f32.mrf.mxu2 }
 0x1fd   :  { %v1042_v26 = vpop.f32.mrf.mxu3  ;;  %1243 = vst.msk [vmem:[#allocation2 + $0xc8] sm:$0xff] %vm1218_vm0, %v1194_v53  ;;  %v966_v38 = vadd.f32 %v965_v56, %v2607_v23 }
 0x1ff   :  { %v1043_v24 = vadd.f32 %v1042_v26, %v966_v38 }
 0x201   :  { %v1120_v17 = vadd.f32 %v1119_v58, %v1043_v24 }
 0x202   :  { %v1122_v10 = vpop.f32.mrf.mxu0  ;;  %v1199_v55 = vpop.f32.mrf.mxu1 }
 0x203   :  { %v1197_v51 = vadd.f32 %v1196_v46, %v1120_v17 }
 0x204   :  { %v968_v4 = vpop.f32.mrf.mxu2 }
 0x205   :  { %v1045_v34 = vpop.f32.mrf.mxu3  ;;  %1245 = vst.msk [vmem:[#allocation2 + $0xd8] sm:$0xff] %vm1218_vm0, %v1197_v51  ;;  %v969_v45 = vadd.f32 %v968_v4, %v2614_v27 }
 0x207   :  { %v1046_v33 = vadd.f32 %v1045_v34, %v969_v45 }
 0x209   :  { %v1123_v40 = vadd.f32 %v1122_v10, %v1046_v33 }
 0x20a   :  { %v1125_v19 = vpop.f32.mrf.mxu0  ;;  %v1202_v57 = vpop.f32.mrf.mxu1 }
 0x20b   :  { %v1200_v54 = vadd.f32 %v1199_v55, %v1123_v40 }
 0x20c   :  { %v971_v7 = vpop.f32.mrf.mxu2 }
 0x20d   :  { %v1048_v37 = vpop.f32.mrf.mxu3  ;;  %1247 = vst.msk [vmem:[#allocation2 + $0xe8] sm:$0xff] %vm1218_vm0, %v1200_v54  ;;  %v972_v23 = vadd.f32 %v971_v7, %v2621_v43 }
 0x20f   :  { %v1049_v50 = vadd.f32 %v1048_v37, %v972_v23 }
 0x211   :  { %v1126_v1 = vadd.f32 %v1125_v19, %v1049_v50 }
 0x212   :  { %v1128_v47 = vpop.f32.mrf.mxu0  ;;  %v1205_v36 = vpop.f32.mrf.mxu1 }
 0x213   :  { %v1203_v62 = vadd.f32 %v1202_v57, %v1126_v1 }
 0x214   :  { %v974_v5 = vpop.f32.mrf.mxu2 }
 0x215   :  { %v1051_v8 = vpop.f32.mrf.mxu3  ;;  %1249 = vst.msk [vmem:[#allocation2 + $0xf8] sm:$0xff] %vm1218_vm0, %v1203_v62  ;;  %v975_v27 = vadd.f32 %v974_v5, %v2628_v60 }
 0x217   :  { %v1052_v32 = vadd.f32 %v1051_v8, %v975_v27 }
 0x219   :  { %v1129_v21 = vadd.f32 %v1128_v47, %v1052_v32 }
 0x21a   :  { %v1131_v41 = vpop.f32.mrf.mxu0  ;;  %v1208_v28 = vpop.f32.mrf.mxu1 }
 0x21b   :  { %v1206_v30 = vadd.f32 %v1205_v36, %v1129_v21 }
 0x21c   :  { %v977_v35 = vpop.f32.mrf.mxu2 }
 0x21d   :  { %v1054_v49 = vpop.f32.mrf.mxu3  ;;  %1251 = vst.msk [vmem:[#allocation2 + $0x108] sm:$0xff] %vm1218_vm0, %v1206_v30  ;;  %v978_v43 = vadd.f32 %v977_v35, %v2635_v25 }
 0x21f   :  { %v1055_v42 = vadd.f32 %v1054_v49, %v978_v43 }
 0x221   :  { %v1132_v0 = vadd.f32 %v1131_v41, %v1055_v42 }
 0x222   :  { %v1134_v13 = vpop.f32.mrf.mxu0  ;;  %v1211_v11 = vpop.f32.mrf.mxu1 }
 0x223   :  { %v1209_v31 = vadd.f32 %v1208_v28, %v1132_v0 }
 0x224   :  { %v980_v39 = vpop.f32.mrf.mxu2 }
 0x225   :  { %v1057_v6 = vpop.f32.mrf.mxu3  ;;  %1253 = vst.msk [vmem:[#allocation2 + $0x118] sm:$0xff] %vm1218_vm0, %v1209_v31  ;;  %v981_v60 = vadd.f32 %v980_v39, %v2642_v61 }
 0x227   :  { %v1058_v9 = vadd.f32 %v1057_v6, %v981_v60 }
 0x229   :  { %v1135_v14 = vadd.f32 %v1134_v13, %v1058_v9 }
 0x22a   :  { %v1137_v12 = vpop.f32.mrf.mxu0  ;;  %v1214_v22 = vpop.f32.mrf.mxu1 }
 0x22b   :  { %v1212_v52 = vadd.f32 %v1211_v11, %v1135_v14 }
 0x22c   :  { %v983_v20 = vpop.f32.mrf.mxu2 }
 0x22d   :  { %v1060_v63 = vpop.f32.mrf.mxu3  ;;  %1255 = vst.msk [vmem:[#allocation2 + $0x128] sm:$0xff] %vm1218_vm0, %v1212_v52  ;;  %v984_v25 = vadd.f32 %v983_v20, %v2649_v16 }
 0x22f   :  { %v1061_v44 = vadd.f32 %v1060_v63, %v984_v25 }
 0x231   :  { %v1138_v61 = vadd.f32 %v1137_v12, %v1061_v44 }
 0x233   :  { %v1215_v3 = vadd.f32 %v1214_v22, %v1138_v61 }
 0x235   :  { %1257 = vst.msk [vmem:[#allocation2 + $0x138] sm:$0xff] %vm1218_vm0, %v1215_v3 }
 0x236   :  { %1270 = dma.vmem_to_hbm [thread:$0]  %s1263_s7, 5120, %s1265_s10, [#allocation3], %s1338_s11, %s1338_s11, %s1339_s12  }
 0x237   :  { %1335 = dma.done.wait [#allocation3], 5120  }
 0x238   :  { %1336 = vsyncadd [#allocation3], 4294962176 }
 0x239   :  { %1275 = vsyncpa [#allocation3], 1 }

</bundles_post_ra>
